<compile_context>
chip_gen: v6e
topology: v6e:2x2x1
jax: 0.10.0
libtpu: 0.0.40
codegen_flags: <defaults>
</compile_context>

<pallas_src>
import functools

import jax
import jax.numpy as jnp
from jax.experimental import pallas as pl
from jax.experimental.pallas import tpu as pltpu

OUT_CLASSES = 10
OUT_PAD = 128          # lane-dense padded class dimension
NEG_BIG = -1e30        # pad-class logit bias -> exp underflows to exactly 0


def lstm_kernel(x_ref, w_ih_ref, w_hh_ref, b_ref, h0_ref, c0_ref,
                w1_ref, b1_ref, w2_ref, b2_ref,
                out_ref, xproj_ref, *, num_layers, hidden, seq_len, batch):
    H, L, T, B = hidden, num_layers, seq_len, batch

    # ---- Phase 1: batched (non-recurrent) layer-0 input projection ---------
    # (T*B, H) @ (H, 4H) as a single MXU call; stored bf16 as (T, B, 4H).
    xproj_ref[...] = (
        jnp.dot(x_ref[...], w_ih_ref[0], preferred_element_type=jnp.float32)
        .reshape(T, B, 4 * H).astype(jnp.bfloat16))

    # ---- Hoisted loop invariants (re-emitted every step otherwise) ---------
    w_hh0 = w_hh_ref[0]                                      # (H, 4H) bf16
    w_ih_up = [w_ih_ref[l] for l in range(1, L)]             # (H, 4H) bf16
    w_hh_up = [w_hh_ref[l] for l in range(1, L)]             # (H, 4H) bf16
    b_bc = [jnp.broadcast_to(b_ref[l], (B, 4 * H)) for l in range(L)]  # f32

    # ---- LSTM cell: gate columns pre-ordered [i, f, o, g]; i/f/o columns of
    # weights/bias pre-scaled by 0.5 on host so one full-lane tanh suffices. --
    def cell(gates, c_prev):
        t_all = jnp.tanh(gates)                              # one EUP pass (B, 4H)
        ifo = 0.5 * t_all[:, :3 * H] + 0.5                   # sigmoid fixup (VPU)
        g = t_all[:, 3 * H:]
        i_g = ifo[:, 0 * H:1 * H]
        f_g = ifo[:, 1 * H:2 * H]
        o_g = ifo[:, 2 * H:3 * H]
        c_new = f_g * c_prev + i_g * g
        h_new = o_g * jnp.tanh(c_new)
        return h_new.astype(jnp.bfloat16), c_new             # h bf16, c f32

    # ---- Phase 2: recurrence over T ----------------------------------------
    def step(t, carry):
        h, c = carry                         # h: tuple (B,H) bf16; c: f32
        # Layer 0: x-path precomputed; only the recurrent matmul remains.
        gates0 = (xproj_ref[t].astype(jnp.float32)
                  + jnp.dot(h[0], w_hh0, preferred_element_type=jnp.float32)
                  + b_bc[0])
        h_n, c_n = cell(gates0, c[0])
        new_h, new_c = [h_n], [c_n]
        inp = h_n
        # Layers 1..L-1: two small matmuls, no lane-dim concatenate.
        for layer in range(1, L):
            gates = (jnp.dot(inp, w_ih_up[layer - 1],
                             preferred_element_type=jnp.float32)
                     + jnp.dot(h[layer], w_hh_up[layer - 1],
                               preferred_element_type=jnp.float32)
                     + b_bc[layer])
            h_n, c_n = cell(gates, c[layer])
            new_h.append(h_n)
            new_c.append(c_n)
            inp = h_n
        return tuple(new_h), tuple(new_c)

    h_init = tuple(h0_ref[l].astype(jnp.bfloat16) for l in range(L))
    c_init = tuple(c0_ref[l] for l in range(L))
    unroll = T if T <= 32 else 8             # bound unroll for long sequences
    h_fin, _ = jax.lax.fori_loop(0, T, step, (h_init, c_init), unroll=unroll)

    # ---- Classifier head (runs once) ----------------------------------------
    h_top = h_fin[L - 1]                                     # (B, H) bf16
    z1 = jnp.maximum(
        jnp.dot(h_top, w1_ref[...], preferred_element_type=jnp.float32)
        + b1_ref[...], 0.0)
    logits = (jnp.dot(z1.astype(jnp.bfloat16), w2_ref[...],
                      preferred_element_type=jnp.float32) + b2_ref[...])
    m = jnp.max(logits, axis=-1, keepdims=True)
    e = jnp.exp(logits - m)
    out_ref[...] = e * pl.reciprocal(jnp.sum(e, axis=-1, keepdims=True),
                                     approx=True)


def _reorder_scale_gates(a, hidden):
    """PyTorch gate order [i, f, g, o] -> [i, f, o, g] along trailing 4H,
    with the i/f/o blocks scaled by 0.5 (sigmoid-via-tanh rewrite)."""
    shp = a.shape
    a4 = a.reshape(shp[:-1] + (4, hidden))
    a4 = a4[..., jnp.array([0, 1, 3, 2]), :]
    scale = jnp.array([0.5, 0.5, 0.5, 1.0], a4.dtype)
    a4 = a4 * scale.reshape((1,) * (a4.ndim - 2) + (4, 1))
    return a4.reshape(shp)


def pack_params(params):
    """Host-side relayout: transpose, gate-reorder + 0.5 i/f/o scale,
    pre-sum biases, bf16 weight storage, lane-dense padded classifier head."""
    w_ih, w_hh = params["w_ih"], params["w_hh"]               # (L, 4H, H)
    L, four_h, H = w_ih.shape
    assert four_h == 4 * H

    w_ih_t = _reorder_scale_gates(jnp.swapaxes(w_ih, 1, 2), H)  # (L, H, 4H)
    w_hh_t = _reorder_scale_gates(jnp.swapaxes(w_hh, 1, 2), H)  # (L, H, 4H)
    b = _reorder_scale_gates(params["b_ih"] + params["b_hh"], H)  # (L, 1, 4H)

    w2p = (jnp.zeros((2 * H, OUT_PAD), jnp.float32)
           .at[:, :OUT_CLASSES].set(params["w2"]))
    b2p = (jnp.full((1, OUT_PAD), NEG_BIG, jnp.float32)
           .at[:, :OUT_CLASSES].set(params["b2"]))

    bf16 = jnp.bfloat16
    return dict(
        w_ih=w_ih_t.astype(bf16),
        w_hh=w_hh_t.astype(bf16),
        b=b.astype(jnp.float32),
        w1=params["w1"].astype(bf16),
        b1=params["b1"].astype(jnp.float32),
        w2p=w2p.astype(bf16),
        b2p=b2p,
        h0=params["h0"].astype(jnp.float32),
        c0=params["c0"].astype(jnp.float32),
    )


def simple_lstm_forward(x_tokens, params):
    """x_tokens: int32 (B, T) token ids. Returns softmax probs (B, 10)."""
    emb = params["embedding"][x_tokens]                        # (B, T, H)
    B, T, H = emb.shape
    L = params["w_ih"].shape[0]
    # Time-major, flattened to (T*B, H), stored bf16 (MXU-native, half DMA).
    x_tm = jnp.transpose(emb, (1, 0, 2)).reshape(T * B, H).astype(jnp.bfloat16)

    kp = pack_params(params)

    kernel = functools.partial(lstm_kernel, num_layers=L, hidden=H,
                               seq_len=T, batch=B)
    full = lambda *shape: pl.BlockSpec(shape, lambda i: (0,) * len(shape))

    # Explicit scoped-VMEM budget (v5e default 16 MiB, v7x 32 MiB scoped).
    vmem_bytes = int(
        2 * (T * B * H * 2)                 # x (bf16), double-buffered input
        + T * B * 4 * H * 2                 # xproj scratch (bf16)
        + 2 * L * H * 4 * H * 2             # W_ih + W_hh (bf16)
        + 2 * L * B * H * 4                 # h0 / c0 (f32)
        + (H * 2 * H + 2 * H * OUT_PAD) * 2  # fc weights (bf16)
        + (4 << 20))                        # biases / head / headroom
    vmem_limit = min(max(vmem_bytes, 8 << 20), 64 << 20)

    out = pl.pallas_call(
        kernel,
        out_shape=jax.ShapeDtypeStruct((B, OUT_PAD), jnp.float32),
        grid_spec=pltpu.PrefetchScalarGridSpec(
            num_scalar_prefetch=0,
            grid=(1,),                      # whole sequence, one invocation
            in_specs=[
                full(T * B, H),             # embedded tokens, time-major (bf16)
                full(L, H, 4 * H),          # W_ih^T, gate-reordered+scaled (bf16)
                full(L, H, 4 * H),          # W_hh^T (bf16)
                full(L, 1, 4 * H),          # pre-summed biases (f32)
                full(L, B, H),              # h0
                full(L, B, H),              # c0
                full(H, 2 * H),             # fc1 weight (bf16)
                full(1, 2 * H),             # fc1 bias
                full(2 * H, OUT_PAD),       # fc2 weight, zero-padded (bf16)
                full(1, OUT_PAD),           # fc2 bias, -1e30-padded
            ],
            out_specs=pl.BlockSpec((B, OUT_PAD), lambda i: (0, 0)),
            scratch_shapes=[pltpu.VMEM((T, B, 4 * H), jnp.bfloat16)],  # xproj
        ),
        compiler_params=pltpu.CompilerParams(
            dimension_semantics=("arbitrary",),
            vmem_limit_bytes=vmem_limit),
    )(x_tm, kp["w_ih"], kp["w_hh"], kp["b"], kp["h0"], kp["c0"],
      kp["w1"], kp["b1"], kp["w2p"], kp["b2p"])
    return out[:, :OUT_CLASSES]


def init_params(key, *, vocab, hidden, num_layers, batch, padding_idx=0):
    keys = jax.random.split(key, 12)
    H, L, B = hidden, num_layers, batch

    # Frozen embedding matrix (stand-in for args.embedding_matrix).
    emb = 0.1 * jax.random.normal(keys[0], (vocab, H), jnp.float32)
    emb = emb.at[padding_idx].set(0.0)

    # nn.LSTM default init: U(-1/sqrt(H), 1/sqrt(H)); gate order [i, f, g, o].
    k = 1.0 / (H ** 0.5)
    u = lambda kk, shape, lim: jax.random.uniform(kk, shape, jnp.float32, -lim, lim)
    w_ih = u(keys[1], (L, 4 * H, H), k)
    w_hh = u(keys[2], (L, 4 * H, H), k)
    b_ih = u(keys[3], (L, 1, 4 * H), k)
    b_hh = u(keys[4], (L, 1, 4 * H), k)

    # nn.Linear default init: U(-1/sqrt(fan_in), 1/sqrt(fan_in)).
    k1 = 1.0 / (H ** 0.5)
    w1 = u(keys[5], (H, 2 * H), k1)
    b1 = u(keys[6], (1, 2 * H), k1)
    k2 = 1.0 / ((2 * H) ** 0.5)
    w2 = u(keys[7], (2 * H, OUT_CLASSES), k2)
    b2 = u(keys[8], (1, OUT_CLASSES), k2)

    # torch.nn.init.xavier_normal_ on (L, B, H): fan_in = B*H, fan_out = L*H.
    std = (2.0 / (B * H + L * H)) ** 0.5
    h0 = std * jax.random.normal(keys[9], (L, B, H), jnp.float32)
    c0 = std * jax.random.normal(keys[10], (L, B, H), jnp.float32)

    return dict(embedding=emb, w_ih=w_ih, w_hh=w_hh, b_ih=b_ih, b_hh=b_hh,
                h0=h0, c0=c0, w1=w1, b1=b1, w2=w2, b2=b2)


if __name__ == "__main__":
    B, T, H, L, VOCAB = 8, 8, 32, 2, 50
    params = init_params(jax.random.PRNGKey(0), vocab=VOCAB, hidden=H,
                         num_layers=L, batch=B, padding_idx=0)
    x = jax.random.randint(jax.random.PRNGKey(1), (B, T), 0, VOCAB,
                           dtype=jnp.int32)
    probs = jax.jit(simple_lstm_forward)(x, params)
    jax.block_until_ready(probs)
    assert probs.shape == (B, OUT_CLASSES)
    assert bool(jnp.all(jnp.isfinite(probs)))
    assert bool(jnp.all(jnp.abs(jnp.sum(probs, axis=-1) - 1.0) < 1e-2))
    print("KERNEL_OK")
</pallas_src>

<mosaic_0001>
module attributes {stable_mosaic.version = 11 : i64} {
  func.func @lstm_kernel(%arg0: i32, %arg1: memref<64x32xbf16, #tpu.memory_space<vmem>>, %arg2: memref<2x32x128xbf16, #tpu.memory_space<vmem>>, %arg3: memref<2x32x128xbf16, #tpu.memory_space<vmem>>, %arg4: memref<2x1x128xf32, #tpu.memory_space<vmem>>, %arg5: memref<2x8x32xf32, #tpu.memory_space<vmem>>, %arg6: memref<2x8x32xf32, #tpu.memory_space<vmem>>, %arg7: memref<32x64xbf16, #tpu.memory_space<vmem>>, %arg8: memref<1x64xf32, #tpu.memory_space<vmem>>, %arg9: memref<64x128xbf16, #tpu.memory_space<vmem>>, %arg10: memref<1x128xf32, #tpu.memory_space<vmem>>, %arg11: memref<8x128xf32, #tpu.memory_space<vmem>>, %arg12: memref<8x8x128xbf16, #tpu.memory_space<vmem>>) attributes {dimension_semantics = [#tpu.dimension_semantics<arbitrary>], iteration_bounds = array<i64: 1>, scalar_prefetch = 0 : i64, scratch_operands = 1 : i64, tpu.core_type = #tpu.core_type<tc>, window_params = [{pipeline_mode = #tpu.pipeline_mode<synchronous>, transform_indices = @transform_0, window_bounds = array<i64: 64, 32>}, {pipeline_mode = #tpu.pipeline_mode<synchronous>, transform_indices = @transform_1, window_bounds = array<i64: 2, 32, 128>}, {pipeline_mode = #tpu.pipeline_mode<synchronous>, transform_indices = @transform_2, window_bounds = array<i64: 2, 32, 128>}, {pipeline_mode = #tpu.pipeline_mode<synchronous>, transform_indices = @transform_3, window_bounds = array<i64: 2, 1, 128>}, {pipeline_mode = #tpu.pipeline_mode<synchronous>, transform_indices = @transform_4, window_bounds = array<i64: 2, 8, 32>}, {pipeline_mode = #tpu.pipeline_mode<synchronous>, transform_indices = @transform_5, window_bounds = array<i64: 2, 8, 32>}, {pipeline_mode = #tpu.pipeline_mode<synchronous>, transform_indices = @transform_6, window_bounds = array<i64: 32, 64>}, {pipeline_mode = #tpu.pipeline_mode<synchronous>, transform_indices = @transform_7, window_bounds = array<i64: 1, 64>}, {pipeline_mode = #tpu.pipeline_mode<synchronous>, transform_indices = @transform_8, window_bounds = array<i64: 64, 128>}, {pipeline_mode = #tpu.pipeline_mode<synchronous>, transform_indices = @transform_9, window_bounds = array<i64: 1, 128>}, {pipeline_mode = #tpu.pipeline_mode<synchronous>, transform_indices = @transform_10, window_bounds = array<i64: 8, 128>}]} {
    %c0 = arith.constant 0 : index
    %c0_0 = arith.constant 0 : index
    %0 = vector.load %arg1[%c0, %c0_0] : memref<64x32xbf16, #tpu.memory_space<vmem>>, vector<64x32xbf16>
    %c0_1 = arith.constant 0 : index
    %c0_2 = arith.constant 0 : index
    %c0_3 = arith.constant 0 : index
    %1 = vector.load %arg2[%c0_1, %c0_2, %c0_3] : memref<2x32x128xbf16, #tpu.memory_space<vmem>>, vector<1x32x128xbf16>
    %2 = vector.shape_cast %1 : vector<1x32x128xbf16> to vector<32x128xbf16>
    %cst = arith.constant dense<0.000000e+00> : vector<64x128xf32>
    %3 = tpu.matmul %0, %2, %cst {dimension_numbers = #tpu.dot_dimension_numbers<[1], [0], [0], [1], [0, 0, 1, 1], [], []>} : vector<64x32xbf16>, vector<32x128xbf16>, vector<64x128xf32> -> vector<64x128xf32>
    %4 = vector.shape_cast %3 : vector<64x128xf32> to vector<8x8x128xf32>
    %5 = arith.truncf %4 : vector<8x8x128xf32> to vector<8x8x128xbf16>
    %c0_4 = arith.constant 0 : index
    %c0_5 = arith.constant 0 : index
    %c0_6 = arith.constant 0 : index
    %6 = vector.load %arg12[%c0_4, %c0_5, %c0_6] : memref<8x8x128xbf16, #tpu.memory_space<vmem>>, vector<8x8x128xbf16>
    tpu.vector_store %arg12[%c0_4, %c0_5, %c0_6], %5 {strides = array<i32>} : memref<8x8x128xbf16, #tpu.memory_space<vmem>>, vector<8x8x128xbf16>,
    %c0_7 = arith.constant 0 : index
    %c0_8 = arith.constant 0 : index
    %c0_9 = arith.constant 0 : index
    %7 = vector.load %arg3[%c0_7, %c0_8, %c0_9] : memref<2x32x128xbf16, #tpu.memory_space<vmem>>, vector<1x32x128xbf16>
    %8 = vector.shape_cast %7 : vector<1x32x128xbf16> to vector<32x128xbf16>
    %c1 = arith.constant 1 : index
    %c0_10 = arith.constant 0 : index
    %c0_11 = arith.constant 0 : index
    %9 = vector.load %arg2[%c1, %c0_10, %c0_11] : memref<2x32x128xbf16, #tpu.memory_space<vmem>>, vector<1x32x128xbf16>
    %10 = vector.shape_cast %9 : vector<1x32x128xbf16> to vector<32x128xbf16>
    %c1_12 = arith.constant 1 : index
    %c0_13 = arith.constant 0 : index
    %c0_14 = arith.constant 0 : index
    %11 = vector.load %arg3[%c1_12, %c0_13, %c0_14] : memref<2x32x128xbf16, #tpu.memory_space<vmem>>, vector<1x32x128xbf16>
    %12 = vector.shape_cast %11 : vector<1x32x128xbf16> to vector<32x128xbf16>
    %c0_15 = arith.constant 0 : index
    %c0_16 = arith.constant 0 : index
    %c0_17 = arith.constant 0 : index
    %13 = vector.load %arg4[%c0_15, %c0_16, %c0_17] : memref<2x1x128xf32, #tpu.memory_space<vmem>>, vector<1x1x128xf32>
    %14 = vector.shape_cast %13 : vector<1x1x128xf32> to vector<1x128xf32>
    %15 = vector.shape_cast %14 : vector<1x128xf32> to vector<1x128xf32>
    %16 = vector.broadcast %15 : vector<1x128xf32> to vector<8x128xf32>
    %c1_18 = arith.constant 1 : index
    %c0_19 = arith.constant 0 : index
    %c0_20 = arith.constant 0 : index
    %17 = vector.load %arg4[%c1_18, %c0_19, %c0_20] : memref<2x1x128xf32, #tpu.memory_space<vmem>>, vector<1x1x128xf32>
    %18 = vector.shape_cast %17 : vector<1x1x128xf32> to vector<1x128xf32>
    %19 = vector.shape_cast %18 : vector<1x128xf32> to vector<1x128xf32>
    %20 = vector.broadcast %19 : vector<1x128xf32> to vector<8x128xf32>
    %c0_21 = arith.constant 0 : index
    %c0_22 = arith.constant 0 : index
    %c0_23 = arith.constant 0 : index
    %21 = vector.load %arg5[%c0_21, %c0_22, %c0_23] : memref<2x8x32xf32, #tpu.memory_space<vmem>>, vector<1x8x32xf32>
    %22 = vector.shape_cast %21 : vector<1x8x32xf32> to vector<8x32xf32>
    %23 = arith.truncf %22 : vector<8x32xf32> to vector<8x32xbf16>
    %c1_24 = arith.constant 1 : index
    %c0_25 = arith.constant 0 : index
    %c0_26 = arith.constant 0 : index
    %24 = vector.load %arg5[%c1_24, %c0_25, %c0_26] : memref<2x8x32xf32, #tpu.memory_space<vmem>>, vector<1x8x32xf32>
    %25 = vector.shape_cast %24 : vector<1x8x32xf32> to vector<8x32xf32>
    %26 = arith.truncf %25 : vector<8x32xf32> to vector<8x32xbf16>
    %c0_27 = arith.constant 0 : index
    %c0_28 = arith.constant 0 : index
    %c0_29 = arith.constant 0 : index
    %27 = vector.load %arg6[%c0_27, %c0_28, %c0_29] : memref<2x8x32xf32, #tpu.memory_space<vmem>>, vector<1x8x32xf32>
    %28 = vector.shape_cast %27 : vector<1x8x32xf32> to vector<8x32xf32>
    %c1_30 = arith.constant 1 : index
    %c0_31 = arith.constant 0 : index
    %c0_32 = arith.constant 0 : index
    %29 = vector.load %arg6[%c1_30, %c0_31, %c0_32] : memref<2x8x32xf32, #tpu.memory_space<vmem>>, vector<1x8x32xf32>
    %30 = vector.shape_cast %29 : vector<1x8x32xf32> to vector<8x32xf32>
    %c0_i32 = arith.constant 0 : i32
    %31 = arith.index_cast %c0_i32 : i32 to index
    %c0_33 = arith.constant 0 : index
    %c0_34 = arith.constant 0 : index
    %32 = vector.load %arg12[%31, %c0_33, %c0_34] : memref<8x8x128xbf16, #tpu.memory_space<vmem>>, vector<1x8x128xbf16>
    %33 = vector.shape_cast %32 : vector<1x8x128xbf16> to vector<8x128xbf16>
    %34 = arith.extf %33 : vector<8x128xbf16> to vector<8x128xf32>
    %cst_35 = arith.constant dense<0.000000e+00> : vector<8x128xf32>
    %35 = tpu.matmul %23, %8, %cst_35 {dimension_numbers = #tpu.dot_dimension_numbers<[1], [0], [0], [1], [0, 0, 1, 1], [], []>} : vector<8x32xbf16>, vector<32x128xbf16>, vector<8x128xf32> -> vector<8x128xf32>
    %36 = arith.addf %34, %35 : vector<8x128xf32>
    %37 = arith.addf %36, %16 : vector<8x128xf32>
    %38 = math.tanh %37 : vector<8x128xf32>
    %39 = vector.extract_strided_slice %38 {offsets = [0, 0], sizes = [8, 96], strides = [1, 1]} : vector<8x128xf32> to vector<8x96xf32>
    %cst_36 = arith.constant 5.000000e-01 : f32
    %40 = vector.broadcast %cst_36 : f32 to vector<8x96xf32>
    %41 = arith.mulf %40, %39 : vector<8x96xf32>
    %cst_37 = arith.constant 5.000000e-01 : f32
    %42 = vector.broadcast %cst_37 : f32 to vector<8x96xf32>
    %43 = arith.addf %41, %42 : vector<8x96xf32>
    %44 = vector.extract_strided_slice %38 {offsets = [0, 96], sizes = [8, 32], strides = [1, 1]} : vector<8x128xf32> to vector<8x32xf32>
    %45 = vector.extract_strided_slice %43 {offsets = [0, 0], sizes = [8, 32], strides = [1, 1]} : vector<8x96xf32> to vector<8x32xf32>
    %46 = vector.extract_strided_slice %43 {offsets = [0, 32], sizes = [8, 32], strides = [1, 1]} : vector<8x96xf32> to vector<8x32xf32>
    %47 = vector.extract_strided_slice %43 {offsets = [0, 64], sizes = [8, 32], strides = [1, 1]} : vector<8x96xf32> to vector<8x32xf32>
    %48 = arith.mulf %46, %28 : vector<8x32xf32>
    %49 = arith.mulf %45, %44 : vector<8x32xf32>
    %50 = arith.addf %48, %49 : vector<8x32xf32>
    %51 = math.tanh %50 : vector<8x32xf32>
    %52 = arith.mulf %47, %51 : vector<8x32xf32>
    %53 = arith.truncf %52 : vector<8x32xf32> to vector<8x32xbf16>
    %cst_38 = arith.constant dense<0.000000e+00> : vector<8x128xf32>
    %54 = tpu.matmul %53, %10, %cst_38 {dimension_numbers = #tpu.dot_dimension_numbers<[1], [0], [0], [1], [0, 0, 1, 1], [], []>} : vector<8x32xbf16>, vector<32x128xbf16>, vector<8x128xf32> -> vector<8x128xf32>
    %cst_39 = arith.constant dense<0.000000e+00> : vector<8x128xf32>
    %55 = tpu.matmul %26, %12, %cst_39 {dimension_numbers = #tpu.dot_dimension_numbers<[1], [0], [0], [1], [0, 0, 1, 1], [], []>} : vector<8x32xbf16>, vector<32x128xbf16>, vector<8x128xf32> -> vector<8x128xf32>
    %56 = arith.addf %54, %55 : vector<8x128xf32>
    %57 = arith.addf %56, %20 : vector<8x128xf32>
    %58 = math.tanh %57 : vector<8x128xf32>
    %59 = vector.extract_strided_slice %58 {offsets = [0, 0], sizes = [8, 96], strides = [1, 1]} : vector<8x128xf32> to vector<8x96xf32>
    %cst_40 = arith.constant 5.000000e-01 : f32
    %60 = vector.broadcast %cst_40 : f32 to vector<8x96xf32>
    %61 = arith.mulf %60, %59 : vector<8x96xf32>
    %cst_41 = arith.constant 5.000000e-01 : f32
    %62 = vector.broadcast %cst_41 : f32 to vector<8x96xf32>
    %63 = arith.addf %61, %62 : vector<8x96xf32>
    %64 = vector.extract_strided_slice %58 {offsets = [0, 96], sizes = [8, 32], strides = [1, 1]} : vector<8x128xf32> to vector<8x32xf32>
    %65 = vector.extract_strided_slice %63 {offsets = [0, 0], sizes = [8, 32], strides = [1, 1]} : vector<8x96xf32> to vector<8x32xf32>
    %66 = vector.extract_strided_slice %63 {offsets = [0, 32], sizes = [8, 32], strides = [1, 1]} : vector<8x96xf32> to vector<8x32xf32>
    %67 = vector.extract_strided_slice %63 {offsets = [0, 64], sizes = [8, 32], strides = [1, 1]} : vector<8x96xf32> to vector<8x32xf32>
    %68 = arith.mulf %66, %30 : vector<8x32xf32>
    %69 = arith.mulf %65, %64 : vector<8x32xf32>
    %70 = arith.addf %68, %69 : vector<8x32xf32>
    %71 = math.tanh %70 : vector<8x32xf32>
    %72 = arith.mulf %67, %71 : vector<8x32xf32>
    %73 = arith.truncf %72 : vector<8x32xf32> to vector<8x32xbf16>
    %c1_i32 = arith.constant 1 : i32
    %74 = arith.index_cast %c1_i32 : i32 to index
    %c0_42 = arith.constant 0 : index
    %c0_43 = arith.constant 0 : index
    %75 = vector.load %arg12[%74, %c0_42, %c0_43] : memref<8x8x128xbf16, #tpu.memory_space<vmem>>, vector<1x8x128xbf16>
    %76 = vector.shape_cast %75 : vector<1x8x128xbf16> to vector<8x128xbf16>
    %77 = arith.extf %76 : vector<8x128xbf16> to vector<8x128xf32>
    %cst_44 = arith.constant dense<0.000000e+00> : vector<8x128xf32>
    %78 = tpu.matmul %53, %8, %cst_44 {dimension_numbers = #tpu.dot_dimension_numbers<[1], [0], [0], [1], [0, 0, 1, 1], [], []>} : vector<8x32xbf16>, vector<32x128xbf16>, vector<8x128xf32> -> vector<8x128xf32>
    %79 = arith.addf %77, %78 : vector<8x128xf32>
    %80 = arith.addf %79, %16 : vector<8x128xf32>
    %81 = math.tanh %80 : vector<8x128xf32>
    %82 = vector.extract_strided_slice %81 {offsets = [0, 0], sizes = [8, 96], strides = [1, 1]} : vector<8x128xf32> to vector<8x96xf32>
    %cst_45 = arith.constant 5.000000e-01 : f32
    %83 = vector.broadcast %cst_45 : f32 to vector<8x96xf32>
    %84 = arith.mulf %83, %82 : vector<8x96xf32>
    %cst_46 = arith.constant 5.000000e-01 : f32
    %85 = vector.broadcast %cst_46 : f32 to vector<8x96xf32>
    %86 = arith.addf %84, %85 : vector<8x96xf32>
    %87 = vector.extract_strided_slice %81 {offsets = [0, 96], sizes = [8, 32], strides = [1, 1]} : vector<8x128xf32> to vector<8x32xf32>
    %88 = vector.extract_strided_slice %86 {offsets = [0, 0], sizes = [8, 32], strides = [1, 1]} : vector<8x96xf32> to vector<8x32xf32>
    %89 = vector.extract_strided_slice %86 {offsets = [0, 32], sizes = [8, 32], strides = [1, 1]} : vector<8x96xf32> to vector<8x32xf32>
    %90 = vector.extract_strided_slice %86 {offsets = [0, 64], sizes = [8, 32], strides = [1, 1]} : vector<8x96xf32> to vector<8x32xf32>
    %91 = arith.mulf %89, %50 : vector<8x32xf32>
    %92 = arith.mulf %88, %87 : vector<8x32xf32>
    %93 = arith.addf %91, %92 : vector<8x32xf32>
    %94 = math.tanh %93 : vector<8x32xf32>
    %95 = arith.mulf %90, %94 : vector<8x32xf32>
    %96 = arith.truncf %95 : vector<8x32xf32> to vector<8x32xbf16>
    %cst_47 = arith.constant dense<0.000000e+00> : vector<8x128xf32>
    %97 = tpu.matmul %96, %10, %cst_47 {dimension_numbers = #tpu.dot_dimension_numbers<[1], [0], [0], [1], [0, 0, 1, 1], [], []>} : vector<8x32xbf16>, vector<32x128xbf16>, vector<8x128xf32> -> vector<8x128xf32>
    %cst_48 = arith.constant dense<0.000000e+00> : vector<8x128xf32>
    %98 = tpu.matmul %73, %12, %cst_48 {dimension_numbers = #tpu.dot_dimension_numbers<[1], [0], [0], [1], [0, 0, 1, 1], [], []>} : vector<8x32xbf16>, vector<32x128xbf16>, vector<8x128xf32> -> vector<8x128xf32>
    %99 = arith.addf %97, %98 : vector<8x128xf32>
    %100 = arith.addf %99, %20 : vector<8x128xf32>
    %101 = math.tanh %100 : vector<8x128xf32>
    %102 = vector.extract_strided_slice %101 {offsets = [0, 0], sizes = [8, 96], strides = [1, 1]} : vector<8x128xf32> to vector<8x96xf32>
    %cst_49 = arith.constant 5.000000e-01 : f32
    %103 = vector.broadcast %cst_49 : f32 to vector<8x96xf32>
    %104 = arith.mulf %103, %102 : vector<8x96xf32>
    %cst_50 = arith.constant 5.000000e-01 : f32
    %105 = vector.broadcast %cst_50 : f32 to vector<8x96xf32>
    %106 = arith.addf %104, %105 : vector<8x96xf32>
    %107 = vector.extract_strided_slice %101 {offsets = [0, 96], sizes = [8, 32], strides = [1, 1]} : vector<8x128xf32> to vector<8x32xf32>
    %108 = vector.extract_strided_slice %106 {offsets = [0, 0], sizes = [8, 32], strides = [1, 1]} : vector<8x96xf32> to vector<8x32xf32>
    %109 = vector.extract_strided_slice %106 {offsets = [0, 32], sizes = [8, 32], strides = [1, 1]} : vector<8x96xf32> to vector<8x32xf32>
    %110 = vector.extract_strided_slice %106 {offsets = [0, 64], sizes = [8, 32], strides = [1, 1]} : vector<8x96xf32> to vector<8x32xf32>
    %111 = arith.mulf %109, %70 : vector<8x32xf32>
    %112 = arith.mulf %108, %107 : vector<8x32xf32>
    %113 = arith.addf %111, %112 : vector<8x32xf32>
    %114 = math.tanh %113 : vector<8x32xf32>
    %115 = arith.mulf %110, %114 : vector<8x32xf32>
    %116 = arith.truncf %115 : vector<8x32xf32> to vector<8x32xbf16>
    %c2_i32 = arith.constant 2 : i32
    %117 = arith.index_cast %c2_i32 : i32 to index
    %c0_51 = arith.constant 0 : index
    %c0_52 = arith.constant 0 : index
    %118 = vector.load %arg12[%117, %c0_51, %c0_52] : memref<8x8x128xbf16, #tpu.memory_space<vmem>>, vector<1x8x128xbf16>
    %119 = vector.shape_cast %118 : vector<1x8x128xbf16> to vector<8x128xbf16>
    %120 = arith.extf %119 : vector<8x128xbf16> to vector<8x128xf32>
    %cst_53 = arith.constant dense<0.000000e+00> : vector<8x128xf32>
    %121 = tpu.matmul %96, %8, %cst_53 {dimension_numbers = #tpu.dot_dimension_numbers<[1], [0], [0], [1], [0, 0, 1, 1], [], []>} : vector<8x32xbf16>, vector<32x128xbf16>, vector<8x128xf32> -> vector<8x128xf32>
    %122 = arith.addf %120, %121 : vector<8x128xf32>
    %123 = arith.addf %122, %16 : vector<8x128xf32>
    %124 = math.tanh %123 : vector<8x128xf32>
    %125 = vector.extract_strided_slice %124 {offsets = [0, 0], sizes = [8, 96], strides = [1, 1]} : vector<8x128xf32> to vector<8x96xf32>
    %cst_54 = arith.constant 5.000000e-01 : f32
    %126 = vector.broadcast %cst_54 : f32 to vector<8x96xf32>
    %127 = arith.mulf %126, %125 : vector<8x96xf32>
    %cst_55 = arith.constant 5.000000e-01 : f32
    %128 = vector.broadcast %cst_55 : f32 to vector<8x96xf32>
    %129 = arith.addf %127, %128 : vector<8x96xf32>
    %130 = vector.extract_strided_slice %124 {offsets = [0, 96], sizes = [8, 32], strides = [1, 1]} : vector<8x128xf32> to vector<8x32xf32>
    %131 = vector.extract_strided_slice %129 {offsets = [0, 0], sizes = [8, 32], strides = [1, 1]} : vector<8x96xf32> to vector<8x32xf32>
    %132 = vector.extract_strided_slice %129 {offsets = [0, 32], sizes = [8, 32], strides = [1, 1]} : vector<8x96xf32> to vector<8x32xf32>
    %133 = vector.extract_strided_slice %129 {offsets = [0, 64], sizes = [8, 32], strides = [1, 1]} : vector<8x96xf32> to vector<8x32xf32>
    %134 = arith.mulf %132, %93 : vector<8x32xf32>
    %135 = arith.mulf %131, %130 : vector<8x32xf32>
    %136 = arith.addf %134, %135 : vector<8x32xf32>
    %137 = math.tanh %136 : vector<8x32xf32>
    %138 = arith.mulf %133, %137 : vector<8x32xf32>
    %139 = arith.truncf %138 : vector<8x32xf32> to vector<8x32xbf16>
    %cst_56 = arith.constant dense<0.000000e+00> : vector<8x128xf32>
    %140 = tpu.matmul %139, %10, %cst_56 {dimension_numbers = #tpu.dot_dimension_numbers<[1], [0], [0], [1], [0, 0, 1, 1], [], []>} : vector<8x32xbf16>, vector<32x128xbf16>, vector<8x128xf32> -> vector<8x128xf32>
    %cst_57 = arith.constant dense<0.000000e+00> : vector<8x128xf32>
    %141 = tpu.matmul %116, %12, %cst_57 {dimension_numbers = #tpu.dot_dimension_numbers<[1], [0], [0], [1], [0, 0, 1, 1], [], []>} : vector<8x32xbf16>, vector<32x128xbf16>, vector<8x128xf32> -> vector<8x128xf32>
    %142 = arith.addf %140, %141 : vector<8x128xf32>
    %143 = arith.addf %142, %20 : vector<8x128xf32>
    %144 = math.tanh %143 : vector<8x128xf32>
    %145 = vector.extract_strided_slice %144 {offsets = [0, 0], sizes = [8, 96], strides = [1, 1]} : vector<8x128xf32> to vector<8x96xf32>
    %cst_58 = arith.constant 5.000000e-01 : f32
    %146 = vector.broadcast %cst_58 : f32 to vector<8x96xf32>
    %147 = arith.mulf %146, %145 : vector<8x96xf32>
    %cst_59 = arith.constant 5.000000e-01 : f32
    %148 = vector.broadcast %cst_59 : f32 to vector<8x96xf32>
    %149 = arith.addf %147, %148 : vector<8x96xf32>
    %150 = vector.extract_strided_slice %144 {offsets = [0, 96], sizes = [8, 32], strides = [1, 1]} : vector<8x128xf32> to vector<8x32xf32>
    %151 = vector.extract_strided_slice %149 {offsets = [0, 0], sizes = [8, 32], strides = [1, 1]} : vector<8x96xf32> to vector<8x32xf32>
    %152 = vector.extract_strided_slice %149 {offsets = [0, 32], sizes = [8, 32], strides = [1, 1]} : vector<8x96xf32> to vector<8x32xf32>
    %153 = vector.extract_strided_slice %149 {offsets = [0, 64], sizes = [8, 32], strides = [1, 1]} : vector<8x96xf32> to vector<8x32xf32>
    %154 = arith.mulf %152, %113 : vector<8x32xf32>
    %155 = arith.mulf %151, %150 : vector<8x32xf32>
    %156 = arith.addf %154, %155 : vector<8x32xf32>
    %157 = math.tanh %156 : vector<8x32xf32>
    %158 = arith.mulf %153, %157 : vector<8x32xf32>
    %159 = arith.truncf %158 : vector<8x32xf32> to vector<8x32xbf16>
    %c3_i32 = arith.constant 3 : i32
    %160 = arith.index_cast %c3_i32 : i32 to index
    %c0_60 = arith.constant 0 : index
    %c0_61 = arith.constant 0 : index
    %161 = vector.load %arg12[%160, %c0_60, %c0_61] : memref<8x8x128xbf16, #tpu.memory_space<vmem>>, vector<1x8x128xbf16>
    %162 = vector.shape_cast %161 : vector<1x8x128xbf16> to vector<8x128xbf16>
    %163 = arith.extf %162 : vector<8x128xbf16> to vector<8x128xf32>
    %cst_62 = arith.constant dense<0.000000e+00> : vector<8x128xf32>
    %164 = tpu.matmul %139, %8, %cst_62 {dimension_numbers = #tpu.dot_dimension_numbers<[1], [0], [0], [1], [0, 0, 1, 1], [], []>} : vector<8x32xbf16>, vector<32x128xbf16>, vector<8x128xf32> -> vector<8x128xf32>
    %165 = arith.addf %163, %164 : vector<8x128xf32>
    %166 = arith.addf %165, %16 : vector<8x128xf32>
    %167 = math.tanh %166 : vector<8x128xf32>
    %168 = vector.extract_strided_slice %167 {offsets = [0, 0], sizes = [8, 96], strides = [1, 1]} : vector<8x128xf32> to vector<8x96xf32>
    %cst_63 = arith.constant 5.000000e-01 : f32
    %169 = vector.broadcast %cst_63 : f32 to vector<8x96xf32>
    %170 = arith.mulf %169, %168 : vector<8x96xf32>
    %cst_64 = arith.constant 5.000000e-01 : f32
    %171 = vector.broadcast %cst_64 : f32 to vector<8x96xf32>
    %172 = arith.addf %170, %171 : vector<8x96xf32>
    %173 = vector.extract_strided_slice %167 {offsets = [0, 96], sizes = [8, 32], strides = [1, 1]} : vector<8x128xf32> to vector<8x32xf32>
    %174 = vector.extract_strided_slice %172 {offsets = [0, 0], sizes = [8, 32], strides = [1, 1]} : vector<8x96xf32> to vector<8x32xf32>
    %175 = vector.extract_strided_slice %172 {offsets = [0, 32], sizes = [8, 32], strides = [1, 1]} : vector<8x96xf32> to vector<8x32xf32>
    %176 = vector.extract_strided_slice %172 {offsets = [0, 64], sizes = [8, 32], strides = [1, 1]} : vector<8x96xf32> to vector<8x32xf32>
    %177 = arith.mulf %175, %136 : vector<8x32xf32>
    %178 = arith.mulf %174, %173 : vector<8x32xf32>
    %179 = arith.addf %177, %178 : vector<8x32xf32>
    %180 = math.tanh %179 : vector<8x32xf32>
    %181 = arith.mulf %176, %180 : vector<8x32xf32>
    %182 = arith.truncf %181 : vector<8x32xf32> to vector<8x32xbf16>
    %cst_65 = arith.constant dense<0.000000e+00> : vector<8x128xf32>
    %183 = tpu.matmul %182, %10, %cst_65 {dimension_numbers = #tpu.dot_dimension_numbers<[1], [0], [0], [1], [0, 0, 1, 1], [], []>} : vector<8x32xbf16>, vector<32x128xbf16>, vector<8x128xf32> -> vector<8x128xf32>
    %cst_66 = arith.constant dense<0.000000e+00> : vector<8x128xf32>
    %184 = tpu.matmul %159, %12, %cst_66 {dimension_numbers = #tpu.dot_dimension_numbers<[1], [0], [0], [1], [0, 0, 1, 1], [], []>} : vector<8x32xbf16>, vector<32x128xbf16>, vector<8x128xf32> -> vector<8x128xf32>
    %185 = arith.addf %183, %184 : vector<8x128xf32>
    %186 = arith.addf %185, %20 : vector<8x128xf32>
    %187 = math.tanh %186 : vector<8x128xf32>
    %188 = vector.extract_strided_slice %187 {offsets = [0, 0], sizes = [8, 96], strides = [1, 1]} : vector<8x128xf32> to vector<8x96xf32>
    %cst_67 = arith.constant 5.000000e-01 : f32
    %189 = vector.broadcast %cst_67 : f32 to vector<8x96xf32>
    %190 = arith.mulf %189, %188 : vector<8x96xf32>
    %cst_68 = arith.constant 5.000000e-01 : f32
    %191 = vector.broadcast %cst_68 : f32 to vector<8x96xf32>
    %192 = arith.addf %190, %191 : vector<8x96xf32>
    %193 = vector.extract_strided_slice %187 {offsets = [0, 96], sizes = [8, 32], strides = [1, 1]} : vector<8x128xf32> to vector<8x32xf32>
    %194 = vector.extract_strided_slice %192 {offsets = [0, 0], sizes = [8, 32], strides = [1, 1]} : vector<8x96xf32> to vector<8x32xf32>
    %195 = vector.extract_strided_slice %192 {offsets = [0, 32], sizes = [8, 32], strides = [1, 1]} : vector<8x96xf32> to vector<8x32xf32>
    %196 = vector.extract_strided_slice %192 {offsets = [0, 64], sizes = [8, 32], strides = [1, 1]} : vector<8x96xf32> to vector<8x32xf32>
    %197 = arith.mulf %195, %156 : vector<8x32xf32>
    %198 = arith.mulf %194, %193 : vector<8x32xf32>
    %199 = arith.addf %197, %198 : vector<8x32xf32>
    %200 = math.tanh %199 : vector<8x32xf32>
    %201 = arith.mulf %196, %200 : vector<8x32xf32>
    %202 = arith.truncf %201 : vector<8x32xf32> to vector<8x32xbf16>
    %c4_i32 = arith.constant 4 : i32
    %203 = arith.index_cast %c4_i32 : i32 to index
    %c0_69 = arith.constant 0 : index
    %c0_70 = arith.constant 0 : index
    %204 = vector.load %arg12[%203, %c0_69, %c0_70] : memref<8x8x128xbf16, #tpu.memory_space<vmem>>, vector<1x8x128xbf16>
    %205 = vector.shape_cast %204 : vector<1x8x128xbf16> to vector<8x128xbf16>
    %206 = arith.extf %205 : vector<8x128xbf16> to vector<8x128xf32>
    %cst_71 = arith.constant dense<0.000000e+00> : vector<8x128xf32>
    %207 = tpu.matmul %182, %8, %cst_71 {dimension_numbers = #tpu.dot_dimension_numbers<[1], [0], [0], [1], [0, 0, 1, 1], [], []>} : vector<8x32xbf16>, vector<32x128xbf16>, vector<8x128xf32> -> vector<8x128xf32>
    %208 = arith.addf %206, %207 : vector<8x128xf32>
    %209 = arith.addf %208, %16 : vector<8x128xf32>
    %210 = math.tanh %209 : vector<8x128xf32>
    %211 = vector.extract_strided_slice %210 {offsets = [0, 0], sizes = [8, 96], strides = [1, 1]} : vector<8x128xf32> to vector<8x96xf32>
    %cst_72 = arith.constant 5.000000e-01 : f32
    %212 = vector.broadcast %cst_72 : f32 to vector<8x96xf32>
    %213 = arith.mulf %212, %211 : vector<8x96xf32>
    %cst_73 = arith.constant 5.000000e-01 : f32
    %214 = vector.broadcast %cst_73 : f32 to vector<8x96xf32>
    %215 = arith.addf %213, %214 : vector<8x96xf32>
    %216 = vector.extract_strided_slice %210 {offsets = [0, 96], sizes = [8, 32], strides = [1, 1]} : vector<8x128xf32> to vector<8x32xf32>
    %217 = vector.extract_strided_slice %215 {offsets = [0, 0], sizes = [8, 32], strides = [1, 1]} : vector<8x96xf32> to vector<8x32xf32>
    %218 = vector.extract_strided_slice %215 {offsets = [0, 32], sizes = [8, 32], strides = [1, 1]} : vector<8x96xf32> to vector<8x32xf32>
    %219 = vector.extract_strided_slice %215 {offsets = [0, 64], sizes = [8, 32], strides = [1, 1]} : vector<8x96xf32> to vector<8x32xf32>
    %220 = arith.mulf %218, %179 : vector<8x32xf32>
    %221 = arith.mulf %217, %216 : vector<8x32xf32>
    %222 = arith.addf %220, %221 : vector<8x32xf32>
    %223 = math.tanh %222 : vector<8x32xf32>
    %224 = arith.mulf %219, %223 : vector<8x32xf32>
    %225 = arith.truncf %224 : vector<8x32xf32> to vector<8x32xbf16>
    %cst_74 = arith.constant dense<0.000000e+00> : vector<8x128xf32>
    %226 = tpu.matmul %225, %10, %cst_74 {dimension_numbers = #tpu.dot_dimension_numbers<[1], [0], [0], [1], [0, 0, 1, 1], [], []>} : vector<8x32xbf16>, vector<32x128xbf16>, vector<8x128xf32> -> vector<8x128xf32>
    %cst_75 = arith.constant dense<0.000000e+00> : vector<8x128xf32>
    %227 = tpu.matmul %202, %12, %cst_75 {dimension_numbers = #tpu.dot_dimension_numbers<[1], [0], [0], [1], [0, 0, 1, 1], [], []>} : vector<8x32xbf16>, vector<32x128xbf16>, vector<8x128xf32> -> vector<8x128xf32>
    %228 = arith.addf %226, %227 : vector<8x128xf32>
    %229 = arith.addf %228, %20 : vector<8x128xf32>
    %230 = math.tanh %229 : vector<8x128xf32>
    %231 = vector.extract_strided_slice %230 {offsets = [0, 0], sizes = [8, 96], strides = [1, 1]} : vector<8x128xf32> to vector<8x96xf32>
    %cst_76 = arith.constant 5.000000e-01 : f32
    %232 = vector.broadcast %cst_76 : f32 to vector<8x96xf32>
    %233 = arith.mulf %232, %231 : vector<8x96xf32>
    %cst_77 = arith.constant 5.000000e-01 : f32
    %234 = vector.broadcast %cst_77 : f32 to vector<8x96xf32>
    %235 = arith.addf %233, %234 : vector<8x96xf32>
    %236 = vector.extract_strided_slice %230 {offsets = [0, 96], sizes = [8, 32], strides = [1, 1]} : vector<8x128xf32> to vector<8x32xf32>
    %237 = vector.extract_strided_slice %235 {offsets = [0, 0], sizes = [8, 32], strides = [1, 1]} : vector<8x96xf32> to vector<8x32xf32>
    %238 = vector.extract_strided_slice %235 {offsets = [0, 32], sizes = [8, 32], strides = [1, 1]} : vector<8x96xf32> to vector<8x32xf32>
    %239 = vector.extract_strided_slice %235 {offsets = [0, 64], sizes = [8, 32], strides = [1, 1]} : vector<8x96xf32> to vector<8x32xf32>
    %240 = arith.mulf %238, %199 : vector<8x32xf32>
    %241 = arith.mulf %237, %236 : vector<8x32xf32>
    %242 = arith.addf %240, %241 : vector<8x32xf32>
    %243 = math.tanh %242 : vector<8x32xf32>
    %244 = arith.mulf %239, %243 : vector<8x32xf32>
    %245 = arith.truncf %244 : vector<8x32xf32> to vector<8x32xbf16>
    %c5_i32 = arith.constant 5 : i32
    %246 = arith.index_cast %c5_i32 : i32 to index
    %c0_78 = arith.constant 0 : index
    %c0_79 = arith.constant 0 : index
    %247 = vector.load %arg12[%246, %c0_78, %c0_79] : memref<8x8x128xbf16, #tpu.memory_space<vmem>>, vector<1x8x128xbf16>
    %248 = vector.shape_cast %247 : vector<1x8x128xbf16> to vector<8x128xbf16>
    %249 = arith.extf %248 : vector<8x128xbf16> to vector<8x128xf32>
    %cst_80 = arith.constant dense<0.000000e+00> : vector<8x128xf32>
    %250 = tpu.matmul %225, %8, %cst_80 {dimension_numbers = #tpu.dot_dimension_numbers<[1], [0], [0], [1], [0, 0, 1, 1], [], []>} : vector<8x32xbf16>, vector<32x128xbf16>, vector<8x128xf32> -> vector<8x128xf32>
    %251 = arith.addf %249, %250 : vector<8x128xf32>
    %252 = arith.addf %251, %16 : vector<8x128xf32>
    %253 = math.tanh %252 : vector<8x128xf32>
    %254 = vector.extract_strided_slice %253 {offsets = [0, 0], sizes = [8, 96], strides = [1, 1]} : vector<8x128xf32> to vector<8x96xf32>
    %cst_81 = arith.constant 5.000000e-01 : f32
    %255 = vector.broadcast %cst_81 : f32 to vector<8x96xf32>
    %256 = arith.mulf %255, %254 : vector<8x96xf32>
    %cst_82 = arith.constant 5.000000e-01 : f32
    %257 = vector.broadcast %cst_82 : f32 to vector<8x96xf32>
    %258 = arith.addf %256, %257 : vector<8x96xf32>
    %259 = vector.extract_strided_slice %253 {offsets = [0, 96], sizes = [8, 32], strides = [1, 1]} : vector<8x128xf32> to vector<8x32xf32>
    %260 = vector.extract_strided_slice %258 {offsets = [0, 0], sizes = [8, 32], strides = [1, 1]} : vector<8x96xf32> to vector<8x32xf32>
    %261 = vector.extract_strided_slice %258 {offsets = [0, 32], sizes = [8, 32], strides = [1, 1]} : vector<8x96xf32> to vector<8x32xf32>
    %262 = vector.extract_strided_slice %258 {offsets = [0, 64], sizes = [8, 32], strides = [1, 1]} : vector<8x96xf32> to vector<8x32xf32>
    %263 = arith.mulf %261, %222 : vector<8x32xf32>
    %264 = arith.mulf %260, %259 : vector<8x32xf32>
    %265 = arith.addf %263, %264 : vector<8x32xf32>
    %266 = math.tanh %265 : vector<8x32xf32>
    %267 = arith.mulf %262, %266 : vector<8x32xf32>
    %268 = arith.truncf %267 : vector<8x32xf32> to vector<8x32xbf16>
    %cst_83 = arith.constant dense<0.000000e+00> : vector<8x128xf32>
    %269 = tpu.matmul %268, %10, %cst_83 {dimension_numbers = #tpu.dot_dimension_numbers<[1], [0], [0], [1], [0, 0, 1, 1], [], []>} : vector<8x32xbf16>, vector<32x128xbf16>, vector<8x128xf32> -> vector<8x128xf32>
    %cst_84 = arith.constant dense<0.000000e+00> : vector<8x128xf32>
    %270 = tpu.matmul %245, %12, %cst_84 {dimension_numbers = #tpu.dot_dimension_numbers<[1], [0], [0], [1], [0, 0, 1, 1], [], []>} : vector<8x32xbf16>, vector<32x128xbf16>, vector<8x128xf32> -> vector<8x128xf32>
    %271 = arith.addf %269, %270 : vector<8x128xf32>
    %272 = arith.addf %271, %20 : vector<8x128xf32>
    %273 = math.tanh %272 : vector<8x128xf32>
    %274 = vector.extract_strided_slice %273 {offsets = [0, 0], sizes = [8, 96], strides = [1, 1]} : vector<8x128xf32> to vector<8x96xf32>
    %cst_85 = arith.constant 5.000000e-01 : f32
    %275 = vector.broadcast %cst_85 : f32 to vector<8x96xf32>
    %276 = arith.mulf %275, %274 : vector<8x96xf32>
    %cst_86 = arith.constant 5.000000e-01 : f32
    %277 = vector.broadcast %cst_86 : f32 to vector<8x96xf32>
    %278 = arith.addf %276, %277 : vector<8x96xf32>
    %279 = vector.extract_strided_slice %273 {offsets = [0, 96], sizes = [8, 32], strides = [1, 1]} : vector<8x128xf32> to vector<8x32xf32>
    %280 = vector.extract_strided_slice %278 {offsets = [0, 0], sizes = [8, 32], strides = [1, 1]} : vector<8x96xf32> to vector<8x32xf32>
    %281 = vector.extract_strided_slice %278 {offsets = [0, 32], sizes = [8, 32], strides = [1, 1]} : vector<8x96xf32> to vector<8x32xf32>
    %282 = vector.extract_strided_slice %278 {offsets = [0, 64], sizes = [8, 32], strides = [1, 1]} : vector<8x96xf32> to vector<8x32xf32>
    %283 = arith.mulf %281, %242 : vector<8x32xf32>
    %284 = arith.mulf %280, %279 : vector<8x32xf32>
    %285 = arith.addf %283, %284 : vector<8x32xf32>
    %286 = math.tanh %285 : vector<8x32xf32>
    %287 = arith.mulf %282, %286 : vector<8x32xf32>
    %288 = arith.truncf %287 : vector<8x32xf32> to vector<8x32xbf16>
    %c6_i32 = arith.constant 6 : i32
    %289 = arith.index_cast %c6_i32 : i32 to index
    %c0_87 = arith.constant 0 : index
    %c0_88 = arith.constant 0 : index
    %290 = vector.load %arg12[%289, %c0_87, %c0_88] : memref<8x8x128xbf16, #tpu.memory_space<vmem>>, vector<1x8x128xbf16>
    %291 = vector.shape_cast %290 : vector<1x8x128xbf16> to vector<8x128xbf16>
    %292 = arith.extf %291 : vector<8x128xbf16> to vector<8x128xf32>
    %cst_89 = arith.constant dense<0.000000e+00> : vector<8x128xf32>
    %293 = tpu.matmul %268, %8, %cst_89 {dimension_numbers = #tpu.dot_dimension_numbers<[1], [0], [0], [1], [0, 0, 1, 1], [], []>} : vector<8x32xbf16>, vector<32x128xbf16>, vector<8x128xf32> -> vector<8x128xf32>
    %294 = arith.addf %292, %293 : vector<8x128xf32>
    %295 = arith.addf %294, %16 : vector<8x128xf32>
    %296 = math.tanh %295 : vector<8x128xf32>
    %297 = vector.extract_strided_slice %296 {offsets = [0, 0], sizes = [8, 96], strides = [1, 1]} : vector<8x128xf32> to vector<8x96xf32>
    %cst_90 = arith.constant 5.000000e-01 : f32
    %298 = vector.broadcast %cst_90 : f32 to vector<8x96xf32>
    %299 = arith.mulf %298, %297 : vector<8x96xf32>
    %cst_91 = arith.constant 5.000000e-01 : f32
    %300 = vector.broadcast %cst_91 : f32 to vector<8x96xf32>
    %301 = arith.addf %299, %300 : vector<8x96xf32>
    %302 = vector.extract_strided_slice %296 {offsets = [0, 96], sizes = [8, 32], strides = [1, 1]} : vector<8x128xf32> to vector<8x32xf32>
    %303 = vector.extract_strided_slice %301 {offsets = [0, 0], sizes = [8, 32], strides = [1, 1]} : vector<8x96xf32> to vector<8x32xf32>
    %304 = vector.extract_strided_slice %301 {offsets = [0, 32], sizes = [8, 32], strides = [1, 1]} : vector<8x96xf32> to vector<8x32xf32>
    %305 = vector.extract_strided_slice %301 {offsets = [0, 64], sizes = [8, 32], strides = [1, 1]} : vector<8x96xf32> to vector<8x32xf32>
    %306 = arith.mulf %304, %265 : vector<8x32xf32>
    %307 = arith.mulf %303, %302 : vector<8x32xf32>
    %308 = arith.addf %306, %307 : vector<8x32xf32>
    %309 = math.tanh %308 : vector<8x32xf32>
    %310 = arith.mulf %305, %309 : vector<8x32xf32>
    %311 = arith.truncf %310 : vector<8x32xf32> to vector<8x32xbf16>
    %cst_92 = arith.constant dense<0.000000e+00> : vector<8x128xf32>
    %312 = tpu.matmul %311, %10, %cst_92 {dimension_numbers = #tpu.dot_dimension_numbers<[1], [0], [0], [1], [0, 0, 1, 1], [], []>} : vector<8x32xbf16>, vector<32x128xbf16>, vector<8x128xf32> -> vector<8x128xf32>
    %cst_93 = arith.constant dense<0.000000e+00> : vector<8x128xf32>
    %313 = tpu.matmul %288, %12, %cst_93 {dimension_numbers = #tpu.dot_dimension_numbers<[1], [0], [0], [1], [0, 0, 1, 1], [], []>} : vector<8x32xbf16>, vector<32x128xbf16>, vector<8x128xf32> -> vector<8x128xf32>
    %314 = arith.addf %312, %313 : vector<8x128xf32>
    %315 = arith.addf %314, %20 : vector<8x128xf32>
    %316 = math.tanh %315 : vector<8x128xf32>
    %317 = vector.extract_strided_slice %316 {offsets = [0, 0], sizes = [8, 96], strides = [1, 1]} : vector<8x128xf32> to vector<8x96xf32>
    %cst_94 = arith.constant 5.000000e-01 : f32
    %318 = vector.broadcast %cst_94 : f32 to vector<8x96xf32>
    %319 = arith.mulf %318, %317 : vector<8x96xf32>
    %cst_95 = arith.constant 5.000000e-01 : f32
    %320 = vector.broadcast %cst_95 : f32 to vector<8x96xf32>
    %321 = arith.addf %319, %320 : vector<8x96xf32>
    %322 = vector.extract_strided_slice %316 {offsets = [0, 96], sizes = [8, 32], strides = [1, 1]} : vector<8x128xf32> to vector<8x32xf32>
    %323 = vector.extract_strided_slice %321 {offsets = [0, 0], sizes = [8, 32], strides = [1, 1]} : vector<8x96xf32> to vector<8x32xf32>
    %324 = vector.extract_strided_slice %321 {offsets = [0, 32], sizes = [8, 32], strides = [1, 1]} : vector<8x96xf32> to vector<8x32xf32>
    %325 = vector.extract_strided_slice %321 {offsets = [0, 64], sizes = [8, 32], strides = [1, 1]} : vector<8x96xf32> to vector<8x32xf32>
    %326 = arith.mulf %324, %285 : vector<8x32xf32>
    %327 = arith.mulf %323, %322 : vector<8x32xf32>
    %328 = arith.addf %326, %327 : vector<8x32xf32>
    %329 = math.tanh %328 : vector<8x32xf32>
    %330 = arith.mulf %325, %329 : vector<8x32xf32>
    %331 = arith.truncf %330 : vector<8x32xf32> to vector<8x32xbf16>
    %c7_i32 = arith.constant 7 : i32
    %332 = arith.index_cast %c7_i32 : i32 to index
    %c0_96 = arith.constant 0 : index
    %c0_97 = arith.constant 0 : index
    %333 = vector.load %arg12[%332, %c0_96, %c0_97] : memref<8x8x128xbf16, #tpu.memory_space<vmem>>, vector<1x8x128xbf16>
    %334 = vector.shape_cast %333 : vector<1x8x128xbf16> to vector<8x128xbf16>
    %335 = arith.extf %334 : vector<8x128xbf16> to vector<8x128xf32>
    %cst_98 = arith.constant dense<0.000000e+00> : vector<8x128xf32>
    %336 = tpu.matmul %311, %8, %cst_98 {dimension_numbers = #tpu.dot_dimension_numbers<[1], [0], [0], [1], [0, 0, 1, 1], [], []>} : vector<8x32xbf16>, vector<32x128xbf16>, vector<8x128xf32> -> vector<8x128xf32>
    %337 = arith.addf %335, %336 : vector<8x128xf32>
    %338 = arith.addf %337, %16 : vector<8x128xf32>
    %339 = math.tanh %338 : vector<8x128xf32>
    %340 = vector.extract_strided_slice %339 {offsets = [0, 0], sizes = [8, 96], strides = [1, 1]} : vector<8x128xf32> to vector<8x96xf32>
    %cst_99 = arith.constant 5.000000e-01 : f32
    %341 = vector.broadcast %cst_99 : f32 to vector<8x96xf32>
    %342 = arith.mulf %341, %340 : vector<8x96xf32>
    %cst_100 = arith.constant 5.000000e-01 : f32
    %343 = vector.broadcast %cst_100 : f32 to vector<8x96xf32>
    %344 = arith.addf %342, %343 : vector<8x96xf32>
    %345 = vector.extract_strided_slice %339 {offsets = [0, 96], sizes = [8, 32], strides = [1, 1]} : vector<8x128xf32> to vector<8x32xf32>
    %346 = vector.extract_strided_slice %344 {offsets = [0, 0], sizes = [8, 32], strides = [1, 1]} : vector<8x96xf32> to vector<8x32xf32>
    %347 = vector.extract_strided_slice %344 {offsets = [0, 32], sizes = [8, 32], strides = [1, 1]} : vector<8x96xf32> to vector<8x32xf32>
    %348 = vector.extract_strided_slice %344 {offsets = [0, 64], sizes = [8, 32], strides = [1, 1]} : vector<8x96xf32> to vector<8x32xf32>
    %349 = arith.mulf %347, %308 : vector<8x32xf32>
    %350 = arith.mulf %346, %345 : vector<8x32xf32>
    %351 = arith.addf %349, %350 : vector<8x32xf32>
    %352 = math.tanh %351 : vector<8x32xf32>
    %353 = arith.mulf %348, %352 : vector<8x32xf32>
    %354 = arith.truncf %353 : vector<8x32xf32> to vector<8x32xbf16>
    %cst_101 = arith.constant dense<0.000000e+00> : vector<8x128xf32>
    %355 = tpu.matmul %354, %10, %cst_101 {dimension_numbers = #tpu.dot_dimension_numbers<[1], [0], [0], [1], [0, 0, 1, 1], [], []>} : vector<8x32xbf16>, vector<32x128xbf16>, vector<8x128xf32> -> vector<8x128xf32>
    %cst_102 = arith.constant dense<0.000000e+00> : vector<8x128xf32>
    %356 = tpu.matmul %331, %12, %cst_102 {dimension_numbers = #tpu.dot_dimension_numbers<[1], [0], [0], [1], [0, 0, 1, 1], [], []>} : vector<8x32xbf16>, vector<32x128xbf16>, vector<8x128xf32> -> vector<8x128xf32>
    %357 = arith.addf %355, %356 : vector<8x128xf32>
    %358 = arith.addf %357, %20 : vector<8x128xf32>
    %359 = math.tanh %358 : vector<8x128xf32>
    %360 = vector.extract_strided_slice %359 {offsets = [0, 0], sizes = [8, 96], strides = [1, 1]} : vector<8x128xf32> to vector<8x96xf32>
    %cst_103 = arith.constant 5.000000e-01 : f32
    %361 = vector.broadcast %cst_103 : f32 to vector<8x96xf32>
    %362 = arith.mulf %361, %360 : vector<8x96xf32>
    %cst_104 = arith.constant 5.000000e-01 : f32
    %363 = vector.broadcast %cst_104 : f32 to vector<8x96xf32>
    %364 = arith.addf %362, %363 : vector<8x96xf32>
    %365 = vector.extract_strided_slice %359 {offsets = [0, 96], sizes = [8, 32], strides = [1, 1]} : vector<8x128xf32> to vector<8x32xf32>
    %366 = vector.extract_strided_slice %364 {offsets = [0, 0], sizes = [8, 32], strides = [1, 1]} : vector<8x96xf32> to vector<8x32xf32>
    %367 = vector.extract_strided_slice %364 {offsets = [0, 32], sizes = [8, 32], strides = [1, 1]} : vector<8x96xf32> to vector<8x32xf32>
    %368 = vector.extract_strided_slice %364 {offsets = [0, 64], sizes = [8, 32], strides = [1, 1]} : vector<8x96xf32> to vector<8x32xf32>
    %369 = arith.mulf %367, %328 : vector<8x32xf32>
    %370 = arith.mulf %366, %365 : vector<8x32xf32>
    %371 = arith.addf %369, %370 : vector<8x32xf32>
    %372 = math.tanh %371 : vector<8x32xf32>
    %373 = arith.mulf %368, %372 : vector<8x32xf32>
    %374 = arith.truncf %373 : vector<8x32xf32> to vector<8x32xbf16>
    %c8_i32 = arith.constant 8 : i32
    %c0_105 = arith.constant 0 : index
    %c0_106 = arith.constant 0 : index
    %375 = vector.load %arg7[%c0_105, %c0_106] : memref<32x64xbf16, #tpu.memory_space<vmem>>, vector<32x64xbf16>
    %cst_107 = arith.constant dense<0.000000e+00> : vector<8x64xf32>
    %376 = tpu.matmul %374, %375, %cst_107 {dimension_numbers = #tpu.dot_dimension_numbers<[1], [0], [0], [1], [0, 0, 1, 1], [], []>} : vector<8x32xbf16>, vector<32x64xbf16>, vector<8x64xf32> -> vector<8x64xf32>
    %c0_108 = arith.constant 0 : index
    %c0_109 = arith.constant 0 : index
    %377 = vector.load %arg8[%c0_108, %c0_109] : memref<1x64xf32, #tpu.memory_space<vmem>>, vector<1x64xf32>
    %378 = vector.broadcast %377 : vector<1x64xf32> to vector<8x64xf32>
    %379 = arith.addf %376, %378 : vector<8x64xf32>
    %cst_110 = arith.constant 0.000000e+00 : f32
    %380 = vector.broadcast %cst_110 : f32 to vector<8x64xf32>
    %381 = arith.maximumf %379, %380 : vector<8x64xf32>
    %382 = arith.truncf %381 : vector<8x64xf32> to vector<8x64xbf16>
    %c0_111 = arith.constant 0 : index
    %c0_112 = arith.constant 0 : index
    %383 = vector.load %arg9[%c0_111, %c0_112] : memref<64x128xbf16, #tpu.memory_space<vmem>>, vector<64x128xbf16>
    %cst_113 = arith.constant dense<0.000000e+00> : vector<8x128xf32>
    %384 = tpu.matmul %382, %383, %cst_113 {dimension_numbers = #tpu.dot_dimension_numbers<[1], [0], [0], [1], [0, 0, 1, 1], [], []>} : vector<8x64xbf16>, vector<64x128xbf16>, vector<8x128xf32> -> vector<8x128xf32>
    %c0_114 = arith.constant 0 : index
    %c0_115 = arith.constant 0 : index
    %385 = vector.load %arg10[%c0_114, %c0_115] : memref<1x128xf32, #tpu.memory_space<vmem>>, vector<1x128xf32>
    %386 = vector.broadcast %385 : vector<1x128xf32> to vector<8x128xf32>
    %387 = arith.addf %384, %386 : vector<8x128xf32>
    %cst_116 = arith.constant dense<0xFF800000> : vector<8xf32>
    %388 = vector.multi_reduction <maximumf>, %387, %cst_116 [1] : vector<8x128xf32> to vector<8xf32>
    %389 = vector.shape_cast %388 : vector<8xf32> to vector<8x1xf32>
    %390 = vector.broadcast %389 : vector<8x1xf32> to vector<8x128xf32>
    %391 = arith.subf %387, %390 : vector<8x128xf32>
    %392 = math.exp %391 : vector<8x128xf32>
    %cst_117 = arith.constant dense<0.000000e+00> : vector<8xf32>
    %393 = vector.multi_reduction <add>, %392, %cst_117 [1] : vector<8x128xf32> to vector<8xf32>
    %394 = vector.shape_cast %393 : vector<8xf32> to vector<8x1xf32>
    %395 = tpu.reciprocal %394 {approx = true} : vector<8x1xf32> -> vector<8x1xf32>
    %396 = vector.broadcast %395 : vector<8x1xf32> to vector<8x128xf32>
    %397 = arith.mulf %392, %396 : vector<8x128xf32>
    %c0_118 = arith.constant 0 : index
    %c0_119 = arith.constant 0 : index
    %398 = vector.load %arg11[%c0_118, %c0_119] : memref<8x128xf32, #tpu.memory_space<vmem>>, vector<8x128xf32>
    tpu.vector_store %arg11[%c0_118, %c0_119], %397 {strides = array<i32>} : memref<8x128xf32, #tpu.memory_space<vmem>>, vector<8x128xf32>,
    return
  }
  func.func @transform_0(%arg0: i32) -> (i32, i32) {
    %c0_i32 = arith.constant 0 : i32
    %c0_i32_0 = arith.constant 0 : i32
    %c0_i32_1 = arith.constant 0 : i32
    return %c0_i32, %c0_i32_0 : i32, i32
  }
  func.func @transform_1(%arg0: i32) -> (i32, i32, i32) {
    %c0_i32 = arith.constant 0 : i32
    %c0_i32_0 = arith.constant 0 : i32
    %c0_i32_1 = arith.constant 0 : i32
    %c0_i32_2 = arith.constant 0 : i32
    return %c0_i32, %c0_i32_0, %c0_i32_1 : i32, i32, i32
  }
  func.func @transform_2(%arg0: i32) -> (i32, i32, i32) {
    %c0_i32 = arith.constant 0 : i32
    %c0_i32_0 = arith.constant 0 : i32
    %c0_i32_1 = arith.constant 0 : i32
    %c0_i32_2 = arith.constant 0 : i32
    return %c0_i32, %c0_i32_0, %c0_i32_1 : i32, i32, i32
  }
  func.func @transform_3(%arg0: i32) -> (i32, i32, i32) {
    %c0_i32 = arith.constant 0 : i32
    %c0_i32_0 = arith.constant 0 : i32
    %c0_i32_1 = arith.constant 0 : i32
    %c0_i32_2 = arith.constant 0 : i32
    return %c0_i32, %c0_i32_0, %c0_i32_1 : i32, i32, i32
  }
  func.func @transform_4(%arg0: i32) -> (i32, i32, i32) {
    %c0_i32 = arith.constant 0 : i32
    %c0_i32_0 = arith.constant 0 : i32
    %c0_i32_1 = arith.constant 0 : i32
    %c0_i32_2 = arith.constant 0 : i32
    return %c0_i32, %c0_i32_0, %c0_i32_1 : i32, i32, i32
  }
  func.func @transform_5(%arg0: i32) -> (i32, i32, i32) {
    %c0_i32 = arith.constant 0 : i32
    %c0_i32_0 = arith.constant 0 : i32
    %c0_i32_1 = arith.constant 0 : i32
    %c0_i32_2 = arith.constant 0 : i32
    return %c0_i32, %c0_i32_0, %c0_i32_1 : i32, i32, i32
  }
  func.func @transform_6(%arg0: i32) -> (i32, i32) {
    %c0_i32 = arith.constant 0 : i32
    %c0_i32_0 = arith.constant 0 : i32
    %c0_i32_1 = arith.constant 0 : i32
    return %c0_i32, %c0_i32_0 : i32, i32
  }
  func.func @transform_7(%arg0: i32) -> (i32, i32) {
    %c0_i32 = arith.constant 0 : i32
    %c0_i32_0 = arith.constant 0 : i32
    %c0_i32_1 = arith.constant 0 : i32
    return %c0_i32, %c0_i32_0 : i32, i32
  }
  func.func @transform_8(%arg0: i32) -> (i32, i32) {
    %c0_i32 = arith.constant 0 : i32
    %c0_i32_0 = arith.constant 0 : i32
    %c0_i32_1 = arith.constant 0 : i32
    return %c0_i32, %c0_i32_0 : i32, i32
  }
  func.func @transform_9(%arg0: i32) -> (i32, i32) {
    %c0_i32 = arith.constant 0 : i32
    %c0_i32_0 = arith.constant 0 : i32
    %c0_i32_1 = arith.constant 0 : i32
    return %c0_i32, %c0_i32_0 : i32, i32
  }
  func.func @transform_10(%arg0: i32) -> (i32, i32) {
    %c0_i32 = arith.constant 0 : i32
    %c0_i32_0 = arith.constant 0 : i32
    %c0_i32_1 = arith.constant 0 : i32
    return %c0_i32, %c0_i32_0 : i32, i32
  }
}

</mosaic_0001>

<bundles_post_ra>
// kernel: simple_lstm_forward.1
= control target key start
LH: loop header
LB: loop body
LE: loop exit
PB: predicated region body
PF: predicated region fallthrough
CT: control target
= control target key end

     0   :  { %vm81_vm0 = vcmask 261120   ;;  %v2385_v3 = vmov 0.0   ;;  %vm2386_vm1 = vmmov 0   ;;  %s2881_s0 = inlined_call_operand.vmem [shape: bf16[64,32], index: 0, kind: input, shape index: {}]   ;;  %s2882_s1 = inlined_call_operand.vmem [shape: bf16[2,32,128], index: 1, kind: input, shape index: {}]   ;;  %s2883_s2 = inlined_call_operand.vmem [shape: bf16[2,32,128], index: 2, kind: input, shape index: {}]   ;;  %s2884_s3 = inlined_call_operand.vmem [shape: f32[2,1,128], index: 3, kind: input, shape index: {}]   ;;  %s2885_s4 = inlined_call_operand.vmem [shape: f32[2,8,32], index: 4, kind: input, shape index: {}]   ;;  %s2886_s5 = inlined_call_operand.vmem [shape: f32[2,8,32], index: 5, kind: input, shape index: {}]   ;;  %s2887_s6 = inlined_call_operand.vmem [shape: bf16[32,64], index: 6, kind: input, shape index: {}]   ;;  %s2888_s7 = inlined_call_operand.vmem [shape: f32[1,64], index: 7, kind: input, shape index: {}]   ;;  %s2889_s8 = inlined_call_operand.vmem [shape: bf16[64,128], index: 8, kind: input, shape index: {}]   ;;  %s2890_s9 = inlined_call_operand.vmem [shape: f32[1,128], index: 9, kind: input, shape index: {}]   ;;  %s2891_s10 = inlined_call_operand.hbm [shape: f32[8,128], index: 10, kind: output, shape index: {}]  }
   0x1   :  { %v2274_v0 = vld [vmem:[%s2882_s1 + $0x8] sm:$0xff]   ;;  %v2275_v1 = vld [vmem:[%s2882_s1] sm:$0xff]   ;;  %2057 = vmatprep.subr.bf16.mxu1 %v2385_v3  ;;  %2061 = vmatprep.mubr.msk.bf16.mxu1 %vm2386_vm1, %v2385_v3 }
   0x2   :  { %2045 = vmatprep.subr.bf16.mxu0 %v2274_v0  ;;  %v2276_v2 = vld [vmem:[%s2881_s0] sm:$0xff]   ;;  %v2277_v4 = vld [vmem:[%s2881_s0 + $0x8] sm:$0xff]  }
   0x3   :  { %2046 = vmatpush3.bf16.msra.mxu0 %v2274_v0  ;;  %2049 = vmatprep.mubr.msk.bf16.mxu0 %vm81_vm0, %v2276_v2  ;;  %v2464_v5 = vld [vmem:[%s2883_s2 + $0x8] sm:$0xff]   ;;  %v2469_v6 = vld [vmem:[%s2883_s2] sm:$0xff]  }
   0x4   :  { %2047 = vmatprep.subr.bf16.mxu0 %v2275_v1  ;;  %2058 = vmatpush3.bf16.msra.mxu1 %v2464_v5  ;;  %v204_v7 = vld [vmem:[%s2885_s4] sm:$0xff] }
   0x5   :  { %2059 = vmatprep.subr.bf16.mxu1 %v2385_v3  ;;  %v205_v8 = vpack.c.bf16 %v204_v7, %v204_v7 }
   0x7   :  { %2048 = vmatpush3.bf16.msra.mxu0 %v2275_v1 }
   0x8   :  { %2073 = vmatprep.subr.bf16.mxu0 %v2385_v3  ;;  %2060 = vmatpush3.bf16.msra.mxu1 %v2469_v6 }
   0x9   :  { %2065 = vmatprep.subr.bf16.mxu1 %v2385_v3 }
   0xa   :  { %2050 = vmatmul.mubr.msk.bf16.vlgmr.msra.gmra.mxu0 %vm81_vm0, %v2277_v4 }
   0xb   :  { %2062 = vmatmul.mubr.msk.bf16.vlgmr.msra.gmra.mxu1 %vm81_vm0, %v205_v8 }
   0xc   :  { %2069 = vmatprep.mubr.msk.bf16.mxu1 %vm2386_vm1, %v2385_v3 }
   0xd   :  { %15 = vsyncpa [#allocation4], 0  ;;  %v2489_v21 = vld [vmem:[%s2884_s3] ss:$0 sm:$0xff]  ;;  %s2387_s29 = smov 32   ;;  %v2504_v34 = vld [vmem:[%s2883_s2 + $0x18] sm:$0xff]  }
   0xe   :  { %v209_v25 = vld [vmem:[%s2886_s5] sm:$0xff]  ;;  %v2509_v35 = vld [vmem:[%s2882_s1 + $0x18] sm:$0xff]   ;;  %v2283_v36 = vld [vmem:[%s2881_s0 + $0x10] sm:$0xff]   ;;  %2066 = vmatpush3.bf16.msra.mxu1 %v2504_v34  ;;  %vm1805_vm2 = vcmask 523264  }
   0xf   :  { %v2284_v37 = vld [vmem:[%s2881_s0 + $0x18] sm:$0xff]   ;;  %v2521_v38 = vld [vmem:[%s2883_s2 + $0x10] sm:$0xff]   ;;  %2074 = vmatpush3.bf16.msra.mxu0 %v2509_v35  ;;  %v1894_v39 = vld [vmem:[%s2885_s4 + $0x8] sm:$0xff]  ;;  %2067 = vmatprep.subr.bf16.mxu1 %v2385_v3  ;;  %s2388_s0 = smov 64  }
  0x10   :  { %v2530_v40 = vld [vmem:[%s2882_s1 + $0x10] sm:$0xff]   ;;  %2053 = vmatprep.mubr.msk.bf16.mxu0 %vm81_vm0, %v2283_v36  ;;  %2075 = vmatprep.subr.bf16.mxu0 %v2385_v3  ;;  %v208_v41 = vpack.c.bf16 %v1894_v39, %v1894_v39  ;;  %v2569_v58 = vld [vmem:[%s2884_s3 + $0x1] ss:$0 sm:$0xff] }
  0x12   :  { %2054 = vmatmul.mubr.msk.bf16.gmra.mxu0 %vm81_vm0, %v2284_v37  ;;  %2068 = vmatpush3.bf16.msra.mxu1 %v2521_v38 }
  0x13   :  { %2077 = vmatprep.mubr.msk.bf16.mxu0 %vm2386_vm1, %v2385_v3  ;;  %2076 = vmatpush3.bf16.msra.mxu0 %v2530_v40 }
  0x14   :  { %2081 = vmatprep.subr.bf16.mxu1 %v2385_v3  ;;  %2089 = vmatprep.subr.bf16.mxu0 %v2385_v3 }
  0x15   :  { %2070 = vmatmul.mubr.msk.bf16.vlgmr.msra.gmra.mxu1 %vm81_vm0, %v208_v41 }
  0x16   :  { %2082 = vmatpush3.bf16.msra.mxu1 %v2464_v5  ;;  %2085 = vmatprep.mubr.msk.bf16.mxu1 %vm2386_vm1, %v2385_v3 }
  0x17   :  { %2083 = vmatprep.subr.bf16.mxu1 %v2385_v3 }
  0x1a   :  { %2084 = vmatpush3.bf16.msra.mxu1 %v2469_v6 }
  0x1b   :  { %2097 = vmatprep.subr.bf16.mxu1 %v2385_v3 }
  0xca   :  { %v2051_v9 = vpop.f32.mrf.mxu0 }
  0xcb   :  { %v263_v11 = vpop.f32.mrf.mxu1 }
  0xcc   :  { %v128_v10 = vpop.f32.mrf.mxu0 }
  0xcd   :  { %v2063_v14 = vpop.f32.mrf.mxu1 }
  0xce   :  { %v2052_v12 = vpop.f32.mrf.mxu0 }
  0xcf   :  { %v1944_v13 = vpack.c.bf16 %v2052_v12, %v2051_v9  ;;  %v266_v17 = vpop.f32.mrf.mxu1  ;;  %v1895_v12 = vld [vmem:[%s2886_s5 + $0x8] sm:$0xff] }
  0xd0   :  { %v131_v15 = vpop.f32.mrf.mxu0 }
  0xd1   :  { %1956 = vst [vmem:[#allocation2 + $0x8] sm:$0xff] %v1944_v13   ;;  %v1939_v16 = vpack.c.bf16 %v131_v15, %v128_v10  ;;  %v2064_v18 = vpop.f32.mrf.mxu1 }
  0xd2   :  { %v2055_v46 = vpop.f32.mrf.mxu0 }
  0xd3   :  { %1940 = vst [vmem:[#allocation2] sm:$0xff] %v1939_v16  }
  0xd4   :  { %v144_v47 = vpop.f32.mrf.mxu0 }
  0xd5   :  { %v345_v49 = vpop.f32.mrf.mxu1 }
  0xd6   :  { %v2056_v48 = vpop.f32.mrf.mxu0 }
  0xd7   :  { %v1954_v50 = vpack.c.bf16 %v2056_v48, %v2055_v46  ;;  %v2071_v52 = vpop.f32.mrf.mxu1 }
  0xd8   :  { %v147_v51 = vpop.f32.mrf.mxu0 }
  0xd9   :  { %1958 = vst [vmem:[#allocation2 + $0x18] sm:$0xff] %v1954_v50   ;;  %v1949_v53 = vpack.c.bf16 %v147_v51, %v144_v47  ;;  %v348_v54 = vpop.f32.mrf.mxu1  ;;  %v2614_v50 = vld [vmem:[#allocation2 + $0x8] sm:$0xff]  }
  0xda   :  { %v2483_v19 = vld [vmem:[#allocation2] sm:$0xff]   ;;  %v617_v54 = vunpack.c.l.bf16 %v2614_v50 }
  0xdb   :  { %v213_v20 = vunpack.c.l.bf16 %v2483_v19  ;;  %1957 = vst [vmem:[#allocation2 + $0x10] sm:$0xff] %v1949_v53   ;;  %v2072_v55 = vpop.f32.mrf.mxu1  ;;  %v437_v57 = vunpack.c.h.bf16 %v2483_v19 }
  0xdd   :  { %v269_v22 = vadd.f32 %v263_v11, %v213_v20 }
  0xdf   :  { %v270_v23 = vadd.f32 %v2489_v21, %v269_v22 }
  0xe1   :  { %2292 = vtanh.f32 %v270_v23 }
  0xee   :  { %v2293_v24 = vpop.eup %2292 }
  0xef   :  { %280 = vrot.lane.b32.xlu0 %v2293_v24, %s2387_s29  ;;  %v272_v26 = vmul.f32 0.5, %v2293_v24 }
  0xf1   :  { %v273_v27 = vadd.f32 0.5, %v272_v26 }
  0xf3   :  { %275 = vrot.lane.b32.xlu0 %v209_v25, %s2387_s29 }
 0x161   :  { %v281_v28 = vpop.permute.xlu0 %280 }
 0x162   :  { %v283_v29 = vmul.f32 %v281_v28, %v273_v27 }
 0x164   :  { %285 = vrot.lane.b32.xlu1 %v283_v29, %s2387_s29 }
 0x165   :  { %v276_v30 = vpop.permute.xlu0 %275 }
 0x166   :  { %v278_v31 = vmul.f32 %v276_v30, %v273_v27 }
 0x1d6   :  { %v286_v32 = vpop.permute.xlu1 %285 }
 0x1d7   :  { %v2498_v33 = vadd.f32 %v286_v32, %v278_v31 }
 0x1d9   :  { %2294 = vtanh.f32 %v2498_v33 }
 0x1e6   :  { %v2295_v42 = vpop.eup %2294 }
 0x1e7   :  { %291 = vrot.lane.b32.xlu1 %v2295_v42, %s2387_s29 }
 0x259   :  { %v292_v43 = vpop.permute.xlu1 %291 }
 0x25a   :  { %v294_v44 = vmul.f32 %v292_v43, %v273_v27 }
 0x25c   :  { %v295_v45 = vpack.c.bf16 %v294_v44, %v294_v44 }
 0x25e   :  { %352 = vrot.lane.b32.xlu0 %v295_v45, %s2388_s0 }
 0x2d0   :  { %v353_v56 = vpop.permute.xlu0 %352 }
 0x2d1   :  { %2078 = vmatmul.mubr.msk.bf16.vlgmr.msra.gmra.mxu0 %vm81_vm0, %v353_v56  ;;  %2086 = vmatmul.mubr.msk.bf16.vlgmr.msra.gmra.mxu1 %vm81_vm0, %v353_v56 }
 0x2d2   :  { %2090 = vmatpush3.bf16.msra.mxu0 %v2504_v34  ;;  %2098 = vmatpush3.bf16.msra.mxu1 %v2509_v35 }
 0x2d3   :  { %2091 = vmatprep.subr.bf16.mxu0 %v2385_v3  ;;  %2099 = vmatprep.subr.bf16.mxu1 %v2385_v3 }
 0x2d4   :  { %2093 = vmatprep.mubr.msk.bf16.mxu0 %vm2386_vm1, %v2385_v3  ;;  %2101 = vmatprep.mubr.msk.bf16.mxu1 %vm2386_vm1, %v2385_v3 }
 0x2d6   :  { %2092 = vmatpush3.bf16.msra.mxu0 %v2521_v38  ;;  %2100 = vmatpush3.bf16.msra.mxu1 %v2530_v40 }
 0x2d7   :  { %2105 = vmatprep.subr.bf16.mxu0 %v2385_v3  ;;  %2113 = vmatprep.subr.bf16.mxu1 %v2385_v3 }
 0x391   :  { %v403_v59 = vpop.f32.mrf.mxu0  ;;  %v472_v60 = vpop.f32.mrf.mxu1 }
 0x392   :  { %v404_v61 = vadd.f32 %v403_v59, %v345_v49  ;;  %v478_v62 = vadd.f32 %v472_v60, %v437_v57 }
 0x393   :  { %v2079_v63 = vpop.f32.mrf.mxu0  ;;  %v2087_v0 = vpop.f32.mrf.mxu1 }
 0x394   :  { %v409_v1 = vadd.f32 %v2569_v58, %v404_v61  ;;  %v479_v2 = vadd.f32 %v2489_v21, %v478_v62 }
 0x395   :  { %v406_v4 = vpop.f32.mrf.mxu0  ;;  %v475_v7 = vpop.f32.mrf.mxu1 }
 0x396   :  { %2296 = vtanh.f32 %v409_v1 }
 0x397   :  { %2298 = vtanh.f32 %v479_v2  ;;  %v2080_v8 = vpop.f32.mrf.mxu0  ;;  %v2088_v9 = vpop.f32.mrf.mxu1 }
 0x3a3   :  { %v2297_v10 = vpop.eup %2296 }
 0x3a4   :  { %v2299_v11 = vpop.eup %2298  ;;  %419 = vrot.lane.b32.xlu1 %v2297_v10, %s2387_s29  ;;  %v411_v13 = vmul.f32 0.5, %v2297_v10 }
 0x3a5   :  { %485 = vrot.lane.b32.xlu0 %v2299_v11, %s2387_s29  ;;  %v481_v14 = vmul.f32 0.5, %v2299_v11 }
 0x3a6   :  { %v412_v15 = vadd.f32 0.5, %v411_v13 }
 0x3a7   :  { %v482_v16 = vadd.f32 0.5, %v481_v14 }
 0x3a8   :  { %414 = vrot.lane.b32.xlu1 %v1895_v12, %s2387_s29 }
 0x3a9   :  { %v483_v24 = vmul.f32 %v482_v16, %v2498_v33 }
 0x416   :  { %v420_v17 = vpop.permute.xlu1 %419 }
 0x417   :  { %v486_v18 = vpop.permute.xlu0 %485  ;;  %v422_v19 = vmul.f32 %v420_v17, %v412_v15 }
 0x418   :  { %v488_v20 = vmul.f32 %v486_v18, %v482_v16 }
 0x419   :  { %424 = vrot.lane.b32.xlu0 %v422_v19, %s2387_s29 }
 0x41a   :  { %490 = vrot.lane.b32.xlu1 %v488_v20, %s2387_s29  ;;  %v415_v22 = vpop.permute.xlu1 %414 }
 0x41b   :  { %v417_v23 = vmul.f32 %v415_v22, %v412_v15 }
 0x48b   :  { %v425_v25 = vpop.permute.xlu0 %424 }
 0x48c   :  { %v491_v26 = vpop.permute.xlu1 %490  ;;  %v2582_v27 = vadd.f32 %v425_v25, %v417_v23 }
 0x48d   :  { %v2584_v28 = vadd.f32 %v491_v26, %v483_v24 }
 0x48e   :  { %2300 = vtanh.f32 %v2582_v27 }
 0x48f   :  { %2302 = vtanh.f32 %v2584_v28 }
 0x49b   :  { %v2301_v29 = vpop.eup %2300 }
 0x49c   :  { %v2303_v30 = vpop.eup %2302  ;;  %430 = vrot.lane.b32.xlu0 %v2301_v29, %s2387_s29 }
 0x49d   :  { %496 = vrot.lane.b32.xlu1 %v2303_v30, %s2387_s29 }
 0x50e   :  { %v431_v31 = vpop.permute.xlu0 %430 }
 0x50f   :  { %v497_v32 = vpop.permute.xlu1 %496  ;;  %v433_v36 = vmul.f32 %v431_v31, %v412_v15 }
 0x510   :  { %v499_v33 = vmul.f32 %v497_v32, %v482_v16 }
 0x511   :  { %v434_v37 = vpack.c.bf16 %v433_v36, %v433_v36  ;;  %v797_v36 = vunpack.c.h.bf16 %v2614_v50 }
 0x512   :  { %v500_v39 = vpack.c.bf16 %v499_v33, %v499_v33 }
 0x513   :  { %502 = vrot.lane.b32.xlu0 %v434_v37, %s2388_s0 }
 0x514   :  { %548 = vrot.lane.b32.xlu1 %v500_v39, %s2388_s0 }
 0x585   :  { %v503_v41 = vpop.permute.xlu0 %502 }
 0x586   :  { %v549_v42 = vpop.permute.xlu1 %548  ;;  %2094 = vmatmul.mubr.msk.bf16.vlgmr.msra.gmra.mxu0 %vm81_vm0, %v503_v41 }
 0x587   :  { %2102 = vmatmul.mubr.msk.bf16.vlgmr.msra.gmra.mxu1 %vm81_vm0, %v549_v42  ;;  %2106 = vmatpush3.bf16.msra.mxu0 %v2464_v5 }
 0x588   :  { %2107 = vmatprep.subr.bf16.mxu0 %v2385_v3  ;;  %2109 = vmatprep.mubr.msk.bf16.mxu0 %vm2386_vm1, %v2385_v3 }
 0x589   :  { %2114 = vmatpush3.bf16.msra.mxu1 %v2504_v34  ;;  %2117 = vmatprep.mubr.msk.bf16.mxu1 %vm2386_vm1, %v2385_v3 }
 0x58a   :  { %2115 = vmatprep.subr.bf16.mxu1 %v2385_v3 }
 0x58b   :  { %2108 = vmatpush3.bf16.msra.mxu0 %v2469_v6 }
 0x58c   :  { %2121 = vmatprep.subr.bf16.mxu0 %v2385_v3 }
 0x58d   :  { %2116 = vmatpush3.bf16.msra.mxu1 %v2521_v38 }
 0x58e   :  { %2110 = vmatmul.mubr.msk.bf16.vlgmr.msra.gmra.mxu0 %vm81_vm0, %v549_v42  ;;  %2129 = vmatprep.subr.bf16.mxu1 %v2385_v3 }
 0x58f   :  { %2122 = vmatpush3.bf16.msra.mxu0 %v2509_v35  ;;  %2125 = vmatprep.mubr.msk.bf16.mxu0 %vm2386_vm1, %v2385_v3 }
 0x590   :  { %2123 = vmatprep.subr.bf16.mxu0 %v2385_v3 }
 0x593   :  { %2124 = vmatpush3.bf16.msra.mxu0 %v2530_v40 }
 0x594   :  { %2137 = vmatprep.subr.bf16.mxu0 %v2385_v3 }
 0x646   :  { %v541_v43 = vpop.f32.mrf.mxu0 }
 0x647   :  { %v587_v44 = vpop.f32.mrf.mxu1 }
 0x648   :  { %v588_v45 = vadd.f32 %v587_v44, %v541_v43  ;;  %v2095_v46 = vpop.f32.mrf.mxu0 }
 0x649   :  { %v2103_v47 = vpop.f32.mrf.mxu1 }
 0x64a   :  { %v593_v48 = vadd.f32 %v2569_v58, %v588_v45  ;;  %v544_v49 = vpop.f32.mrf.mxu0 }
 0x64b   :  { %v590_v51 = vpop.f32.mrf.mxu1 }
 0x64c   :  { %2304 = vtanh.f32 %v593_v48  ;;  %v2096_v52 = vpop.f32.mrf.mxu0 }
 0x64d   :  { %v2104_v53 = vpop.f32.mrf.mxu1 }
 0x64e   :  { %v652_v55 = vpop.f32.mrf.mxu0 }
 0x64f   :  { %v658_v56 = vadd.f32 %v652_v55, %v617_v54 }
 0x650   :  { %v2111_v57 = vpop.f32.mrf.mxu0 }
 0x651   :  { %v659_v59 = vadd.f32 %v2489_v21, %v658_v56 }
 0x652   :  { %v655_v60 = vpop.f32.mrf.mxu0 }
 0x653   :  { %2306 = vtanh.f32 %v659_v59 }
 0x654   :  { %v2112_v61 = vpop.f32.mrf.mxu0 }
 0x659   :  { %v2305_v62 = vpop.eup %2304 }
 0x65a   :  { %599 = vrot.lane.b32.xlu0 %v2305_v62, %s2387_s29  ;;  %v595_v0 = vmul.f32 0.5, %v2305_v62 }
 0x65c   :  { %v596_v1 = vadd.f32 0.5, %v595_v0 }
 0x65e   :  { %v597_v11 = vmul.f32 %v596_v1, %v2582_v27 }
 0x660   :  { %v2307_v63 = vpop.eup %2306 }
 0x661   :  { %665 = vrot.lane.b32.xlu1 %v2307_v63, %s2387_s29  ;;  %v661_v7 = vmul.f32 0.5, %v2307_v63 }
 0x663   :  { %v662_v8 = vadd.f32 0.5, %v661_v7 }
 0x665   :  { %v663_v14 = vmul.f32 %v662_v8, %v2584_v28 }
 0x6cc   :  { %v600_v2 = vpop.permute.xlu0 %599 }
 0x6cd   :  { %v602_v4 = vmul.f32 %v600_v2, %v596_v1 }
 0x6cf   :  { %604 = vrot.lane.b32.xlu0 %v602_v4, %s2387_s29 }
 0x6d3   :  { %v666_v9 = vpop.permute.xlu1 %665 }
 0x6d4   :  { %v668_v10 = vmul.f32 %v666_v9, %v662_v8 }
 0x6d6   :  { %670 = vrot.lane.b32.xlu1 %v668_v10, %s2387_s29 }
 0x741   :  { %v605_v12 = vpop.permute.xlu0 %604 }
 0x742   :  { %v2623_v13 = vadd.f32 %v605_v12, %v597_v11 }
 0x744   :  { %2308 = vtanh.f32 %v2623_v13 }
 0x748   :  { %v671_v15 = vpop.permute.xlu1 %670 }
 0x749   :  { %v2627_v16 = vadd.f32 %v671_v15, %v663_v14 }
 0x74b   :  { %2310 = vtanh.f32 %v2627_v16 }
 0x751   :  { %v2309_v17 = vpop.eup %2308 }
 0x752   :  { %610 = vrot.lane.b32.xlu0 %v2309_v17, %s2387_s29 }
 0x758   :  { %v2311_v18 = vpop.eup %2310 }
 0x759   :  { %676 = vrot.lane.b32.xlu1 %v2311_v18, %s2387_s29 }
 0x7c4   :  { %v611_v19 = vpop.permute.xlu0 %610 }
 0x7c5   :  { %v613_v20 = vmul.f32 %v611_v19, %v596_v1 }
 0x7c7   :  { %v614_v22 = vpack.c.bf16 %v613_v20, %v613_v20 }
 0x7c9   :  { %682 = vrot.lane.b32.xlu0 %v614_v22, %s2388_s0 }
 0x7cb   :  { %v677_v23 = vpop.permute.xlu1 %676 }
 0x7cc   :  { %v679_v24 = vmul.f32 %v677_v23, %v662_v8  ;;  %v2696_v23 = vld [vmem:[#allocation2 + $0x10] sm:$0xff]  }
 0x7ce   :  { %v680_v25 = vpack.c.bf16 %v679_v24, %v679_v24 }
 0x7d0   :  { %728 = vrot.lane.b32.xlu1 %v680_v25, %s2388_s0 }
 0x83b   :  { %v683_v26 = vpop.permute.xlu0 %682 }
 0x83c   :  { %2118 = vmatmul.mubr.msk.bf16.vlgmr.msra.gmra.mxu1 %vm81_vm0, %v683_v26 }
 0x83d   :  { %2130 = vmatpush3.bf16.msra.mxu1 %v2464_v5  ;;  %2133 = vmatprep.mubr.msk.bf16.mxu1 %vm2386_vm1, %v2385_v3 }
 0x83e   :  { %2131 = vmatprep.subr.bf16.mxu1 %v2385_v3 }
 0x841   :  { %2132 = vmatpush3.bf16.msra.mxu1 %v2469_v6 }
 0x842   :  { %v729_v27 = vpop.permute.xlu1 %728  ;;  %2145 = vmatprep.subr.bf16.mxu1 %v2385_v3 }
 0x843   :  { %2126 = vmatmul.mubr.msk.bf16.vlgmr.msra.gmra.mxu0 %vm81_vm0, %v729_v27 }
 0x844   :  { %2134 = vmatmul.mubr.msk.bf16.vlgmr.msra.gmra.mxu1 %vm81_vm0, %v729_v27  ;;  %2138 = vmatpush3.bf16.msra.mxu0 %v2504_v34  ;;  %v977_v27 = vunpack.c.l.bf16 %v2696_v23 }
 0x845   :  { %2146 = vmatpush3.bf16.msra.mxu1 %v2509_v35  ;;  %2139 = vmatprep.subr.bf16.mxu0 %v2385_v3 }
 0x846   :  { %2147 = vmatprep.subr.bf16.mxu1 %v2385_v3  ;;  %2149 = vmatprep.mubr.msk.bf16.mxu1 %vm2386_vm1, %v2385_v3 }
 0x847   :  { %2141 = vmatprep.mubr.msk.bf16.mxu0 %vm2386_vm1, %v2385_v3 }
 0x848   :  { %2140 = vmatpush3.bf16.msra.mxu0 %v2521_v38 }
 0x849   :  { %2148 = vmatpush3.bf16.msra.mxu1 %v2530_v40  ;;  %2153 = vmatprep.subr.bf16.mxu0 %v2385_v3 }
 0x84a   :  { %2161 = vmatprep.subr.bf16.mxu1 %v2385_v3 }
 0x8fc   :  { %v721_v28 = vpop.f32.mrf.mxu1 }
 0x8fe   :  { %v2119_v29 = vpop.f32.mrf.mxu1 }
 0x900   :  { %v724_v30 = vpop.f32.mrf.mxu1 }
 0x902   :  { %v2120_v31 = vpop.f32.mrf.mxu1 }
 0x903   :  { %v767_v32 = vpop.f32.mrf.mxu0 }
 0x904   :  { %v768_v33 = vadd.f32 %v767_v32, %v721_v28  ;;  %v832_v37 = vpop.f32.mrf.mxu1 }
 0x905   :  { %v838_v39 = vadd.f32 %v832_v37, %v797_v36  ;;  %v2127_v41 = vpop.f32.mrf.mxu0 }
 0x906   :  { %v773_v42 = vadd.f32 %v2569_v58, %v768_v33  ;;  %v2135_v43 = vpop.f32.mrf.mxu1 }
 0x907   :  { %v839_v44 = vadd.f32 %v2489_v21, %v838_v39  ;;  %v770_v45 = vpop.f32.mrf.mxu0 }
 0x908   :  { %2312 = vtanh.f32 %v773_v42  ;;  %v835_v46 = vpop.f32.mrf.mxu1 }
 0x909   :  { %2314 = vtanh.f32 %v839_v44  ;;  %v2128_v47 = vpop.f32.mrf.mxu0 }
 0x90a   :  { %v2136_v48 = vpop.f32.mrf.mxu1 }
 0x915   :  { %v2313_v49 = vpop.eup %2312 }
 0x916   :  { %v2315_v51 = vpop.eup %2314  ;;  %779 = vrot.lane.b32.xlu0 %v2313_v49, %s2387_s29  ;;  %v775_v50 = vmul.f32 0.5, %v2313_v49 }
 0x917   :  { %845 = vrot.lane.b32.xlu1 %v2315_v51, %s2387_s29  ;;  %v841_v52 = vmul.f32 0.5, %v2315_v51 }
 0x918   :  { %v776_v53 = vadd.f32 0.5, %v775_v50 }
 0x919   :  { %v842_v54 = vadd.f32 0.5, %v841_v52 }
 0x91a   :  { %v777_v60 = vmul.f32 %v776_v53, %v2623_v13 }
 0x91b   :  { %v843_v61 = vmul.f32 %v842_v54, %v2627_v16 }
 0x988   :  { %v780_v55 = vpop.permute.xlu0 %779 }
 0x989   :  { %v846_v56 = vpop.permute.xlu1 %845  ;;  %v782_v57 = vmul.f32 %v780_v55, %v776_v53 }
 0x98a   :  { %v848_v59 = vmul.f32 %v846_v56, %v842_v54 }
 0x98b   :  { %784 = vrot.lane.b32.xlu0 %v782_v57, %s2387_s29 }
 0x98c   :  { %850 = vrot.lane.b32.xlu1 %v848_v59, %s2387_s29 }
 0x9fd   :  { %v785_v62 = vpop.permute.xlu0 %784 }
 0x9fe   :  { %v851_v63 = vpop.permute.xlu1 %850  ;;  %v2664_v0 = vadd.f32 %v785_v62, %v777_v60 }
 0x9ff   :  { %v2666_v1 = vadd.f32 %v851_v63, %v843_v61 }
 0xa00   :  { %2316 = vtanh.f32 %v2664_v0 }
 0xa01   :  { %2318 = vtanh.f32 %v2666_v1 }
 0xa0d   :  { %v2317_v2 = vpop.eup %2316 }
 0xa0e   :  { %v2319_v4 = vpop.eup %2318  ;;  %790 = vrot.lane.b32.xlu0 %v2317_v2, %s2387_s29 }
 0xa0f   :  { %856 = vrot.lane.b32.xlu1 %v2319_v4, %s2387_s29 }
 0xa80   :  { %v791_v7 = vpop.permute.xlu0 %790 }
 0xa81   :  { %v857_v8 = vpop.permute.xlu1 %856  ;;  %v793_v9 = vmul.f32 %v791_v7, %v776_v53 }
 0xa82   :  { %v859_v10 = vmul.f32 %v857_v8, %v842_v54 }
 0xa83   :  { %v794_v11 = vpack.c.bf16 %v793_v9, %v793_v9  ;;  %v1157_v9 = vunpack.c.h.bf16 %v2696_v23 }
 0xa84   :  { %v860_v12 = vpack.c.bf16 %v859_v10, %v859_v10 }
 0xa85   :  { %862 = vrot.lane.b32.xlu0 %v794_v11, %s2388_s0 }
 0xa86   :  { %908 = vrot.lane.b32.xlu1 %v860_v12, %s2388_s0 }
 0xaf7   :  { %v863_v13 = vpop.permute.xlu0 %862 }
 0xaf8   :  { %v909_v14 = vpop.permute.xlu1 %908  ;;  %2142 = vmatmul.mubr.msk.bf16.vlgmr.msra.gmra.mxu0 %vm81_vm0, %v863_v13 }
 0xaf9   :  { %2150 = vmatmul.mubr.msk.bf16.vlgmr.msra.gmra.mxu1 %vm81_vm0, %v909_v14  ;;  %2154 = vmatpush3.bf16.msra.mxu0 %v2464_v5 }
 0xafa   :  { %2155 = vmatprep.subr.bf16.mxu0 %v2385_v3  ;;  %2157 = vmatprep.mubr.msk.bf16.mxu0 %vm2386_vm1, %v2385_v3 }
 0xafb   :  { %2162 = vmatpush3.bf16.msra.mxu1 %v2504_v34  ;;  %2165 = vmatprep.mubr.msk.bf16.mxu1 %vm2386_vm1, %v2385_v3 }
 0xafc   :  { %2163 = vmatprep.subr.bf16.mxu1 %v2385_v3 }
 0xafd   :  { %2156 = vmatpush3.bf16.msra.mxu0 %v2469_v6 }
 0xafe   :  { %2169 = vmatprep.subr.bf16.mxu0 %v2385_v3 }
 0xaff   :  { %2164 = vmatpush3.bf16.msra.mxu1 %v2521_v38 }
 0xb00   :  { %2158 = vmatmul.mubr.msk.bf16.vlgmr.msra.gmra.mxu0 %vm81_vm0, %v909_v14  ;;  %2177 = vmatprep.subr.bf16.mxu1 %v2385_v3 }
 0xb01   :  { %2170 = vmatpush3.bf16.msra.mxu0 %v2509_v35  ;;  %2173 = vmatprep.mubr.msk.bf16.mxu0 %vm2386_vm1, %v2385_v3 }
 0xb02   :  { %2171 = vmatprep.subr.bf16.mxu0 %v2385_v3 }
 0xb05   :  { %2172 = vmatpush3.bf16.msra.mxu0 %v2530_v40 }
 0xb06   :  { %2185 = vmatprep.subr.bf16.mxu0 %v2385_v3 }
 0xbb8   :  { %v901_v15 = vpop.f32.mrf.mxu0 }
 0xbb9   :  { %v947_v16 = vpop.f32.mrf.mxu1 }
 0xbba   :  { %v948_v17 = vadd.f32 %v947_v16, %v901_v15  ;;  %v2143_v18 = vpop.f32.mrf.mxu0 }
 0xbbb   :  { %v2151_v19 = vpop.f32.mrf.mxu1 }
 0xbbc   :  { %v953_v20 = vadd.f32 %v2569_v58, %v948_v17  ;;  %v904_v22 = vpop.f32.mrf.mxu0 }
 0xbbd   :  { %v950_v24 = vpop.f32.mrf.mxu1 }
 0xbbe   :  { %2320 = vtanh.f32 %v953_v20  ;;  %v2144_v25 = vpop.f32.mrf.mxu0 }
 0xbbf   :  { %v2152_v26 = vpop.f32.mrf.mxu1 }
 0xbc0   :  { %v1012_v28 = vpop.f32.mrf.mxu0 }
 0xbc1   :  { %v1018_v29 = vadd.f32 %v1012_v28, %v977_v27 }
 0xbc2   :  { %v2159_v30 = vpop.f32.mrf.mxu0 }
 0xbc3   :  { %v1019_v31 = vadd.f32 %v2489_v21, %v1018_v29 }
 0xbc4   :  { %v1015_v32 = vpop.f32.mrf.mxu0 }
 0xbc5   :  { %2322 = vtanh.f32 %v1019_v31 }
 0xbc6   :  { %v2160_v36 = vpop.f32.mrf.mxu0 }
 0xbcb   :  { %v2321_v33 = vpop.eup %2320 }
 0xbcc   :  { %959 = vrot.lane.b32.xlu0 %v2321_v33, %s2387_s29  ;;  %v955_v39 = vmul.f32 0.5, %v2321_v33 }
 0xbce   :  { %v956_v41 = vadd.f32 0.5, %v955_v39 }
 0xbd0   :  { %v957_v48 = vmul.f32 %v956_v41, %v2664_v0 }
 0xbd2   :  { %v2323_v37 = vpop.eup %2322 }
 0xbd3   :  { %1025 = vrot.lane.b32.xlu1 %v2323_v37, %s2387_s29  ;;  %v1021_v44 = vmul.f32 0.5, %v2323_v37 }
 0xbd5   :  { %v1022_v45 = vadd.f32 0.5, %v1021_v44 }
 0xbd7   :  { %v1023_v50 = vmul.f32 %v1022_v45, %v2666_v1 }
 0xc3e   :  { %v960_v42 = vpop.permute.xlu0 %959 }
 0xc3f   :  { %v962_v43 = vmul.f32 %v960_v42, %v956_v41 }
 0xc41   :  { %964 = vrot.lane.b32.xlu0 %v962_v43, %s2387_s29 }
 0xc45   :  { %v1026_v46 = vpop.permute.xlu1 %1025 }
 0xc46   :  { %v1028_v47 = vmul.f32 %v1026_v46, %v1022_v45 }
 0xc48   :  { %1030 = vrot.lane.b32.xlu1 %v1028_v47, %s2387_s29 }
 0xcb3   :  { %v965_v49 = vpop.permute.xlu0 %964 }
 0xcb4   :  { %v2705_v51 = vadd.f32 %v965_v49, %v957_v48 }
 0xcb6   :  { %2324 = vtanh.f32 %v2705_v51 }
 0xcba   :  { %v1031_v52 = vpop.permute.xlu1 %1030 }
 0xcbb   :  { %v2709_v53 = vadd.f32 %v1031_v52, %v1023_v50 }
 0xcbd   :  { %2326 = vtanh.f32 %v2709_v53 }
 0xcc3   :  { %v2325_v54 = vpop.eup %2324 }
 0xcc4   :  { %970 = vrot.lane.b32.xlu0 %v2325_v54, %s2387_s29 }
 0xcca   :  { %v2327_v55 = vpop.eup %2326 }
 0xccb   :  { %1036 = vrot.lane.b32.xlu1 %v2327_v55, %s2387_s29 }
 0xd36   :  { %v971_v56 = vpop.permute.xlu0 %970 }
 0xd37   :  { %v973_v57 = vmul.f32 %v971_v56, %v956_v41 }
 0xd39   :  { %v974_v59 = vpack.c.bf16 %v973_v57, %v973_v57  ;;  %v2778_v57 = vld [vmem:[#allocation2 + $0x18] sm:$0xff]  }
 0xd3b   :  { %1042 = vrot.lane.b32.xlu0 %v974_v59, %s2388_s0 }
 0xd3d   :  { %v1037_v60 = vpop.permute.xlu1 %1036 }
 0xd3e   :  { %v1039_v61 = vmul.f32 %v1037_v60, %v1022_v45 }
 0xd40   :  { %v1040_v62 = vpack.c.bf16 %v1039_v61, %v1039_v61 }
 0xd42   :  { %1088 = vrot.lane.b32.xlu1 %v1040_v62, %s2388_s0  ;;  %v1337_v62 = vunpack.c.l.bf16 %v2778_v57 }
 0xdad   :  { %v1043_v63 = vpop.permute.xlu0 %1042 }
 0xdae   :  { %2166 = vmatmul.mubr.msk.bf16.vlgmr.msra.gmra.mxu1 %vm81_vm0, %v1043_v63 }
 0xdaf   :  { %2178 = vmatpush3.bf16.msra.mxu1 %v2464_v5  ;;  %2181 = vmatprep.mubr.msk.bf16.mxu1 %vm2386_vm1, %v2385_v3 }
 0xdb0   :  { %2179 = vmatprep.subr.bf16.mxu1 %v2385_v3 }
 0xdb3   :  { %2180 = vmatpush3.bf16.msra.mxu1 %v2469_v6 }
 0xdb4   :  { %v1089_v0 = vpop.permute.xlu1 %1088  ;;  %2193 = vmatprep.subr.bf16.mxu1 %v2385_v3 }
 0xdb5   :  { %2174 = vmatmul.mubr.msk.bf16.vlgmr.msra.gmra.mxu0 %vm81_vm0, %v1089_v0 }
 0xdb6   :  { %2182 = vmatmul.mubr.msk.bf16.vlgmr.msra.gmra.mxu1 %vm81_vm0, %v1089_v0  ;;  %2186 = vmatpush3.bf16.msra.mxu0 %v2504_v34 }
 0xdb7   :  { %2194 = vmatpush3.bf16.msra.mxu1 %v2509_v35  ;;  %2187 = vmatprep.subr.bf16.mxu0 %v2385_v3 }
 0xdb8   :  { %2195 = vmatprep.subr.bf16.mxu1 %v2385_v3  ;;  %2197 = vmatprep.mubr.msk.bf16.mxu1 %vm2386_vm1, %v2385_v3 }
 0xdb9   :  { %2189 = vmatprep.mubr.msk.bf16.mxu0 %vm2386_vm1, %v2385_v3 }
 0xdba   :  { %2188 = vmatpush3.bf16.msra.mxu0 %v2521_v38 }
 0xdbb   :  { %2196 = vmatpush3.bf16.msra.mxu1 %v2530_v40  ;;  %2201 = vmatprep.subr.bf16.mxu0 %v2385_v3 }
 0xdbc   :  { %2209 = vmatprep.subr.bf16.mxu1 %v2385_v3 }
 0xe6e   :  { %v1081_v1 = vpop.f32.mrf.mxu1 }
 0xe70   :  { %v2167_v2 = vpop.f32.mrf.mxu1 }
 0xe72   :  { %v1084_v4 = vpop.f32.mrf.mxu1 }
 0xe74   :  { %v2168_v7 = vpop.f32.mrf.mxu1 }
 0xe75   :  { %v1127_v8 = vpop.f32.mrf.mxu0 }
 0xe76   :  { %v1128_v10 = vadd.f32 %v1127_v8, %v1081_v1  ;;  %v1192_v11 = vpop.f32.mrf.mxu1 }
 0xe77   :  { %v1198_v12 = vadd.f32 %v1192_v11, %v1157_v9  ;;  %v2175_v13 = vpop.f32.mrf.mxu0 }
 0xe78   :  { %v1133_v14 = vadd.f32 %v2569_v58, %v1128_v10  ;;  %v2183_v15 = vpop.f32.mrf.mxu1 }
 0xe79   :  { %v1199_v16 = vadd.f32 %v2489_v21, %v1198_v12  ;;  %v1130_v17 = vpop.f32.mrf.mxu0 }
 0xe7a   :  { %2328 = vtanh.f32 %v1133_v14  ;;  %v1195_v18 = vpop.f32.mrf.mxu1 }
 0xe7b   :  { %2330 = vtanh.f32 %v1199_v16  ;;  %v2176_v19 = vpop.f32.mrf.mxu0 }
 0xe7c   :  { %v2184_v20 = vpop.f32.mrf.mxu1 }
 0xe87   :  { %v2329_v22 = vpop.eup %2328 }
 0xe88   :  { %v2331_v24 = vpop.eup %2330  ;;  %1139 = vrot.lane.b32.xlu0 %v2329_v22, %s2387_s29  ;;  %v1135_v23 = vmul.f32 0.5, %v2329_v22 }
 0xe89   :  { %1205 = vrot.lane.b32.xlu1 %v2331_v24, %s2387_s29  ;;  %v1201_v25 = vmul.f32 0.5, %v2331_v24 }
 0xe8a   :  { %v1136_v26 = vadd.f32 0.5, %v1135_v23 }
 0xe8b   :  { %v1202_v27 = vadd.f32 0.5, %v1201_v25 }
 0xe8c   :  { %v1137_v32 = vmul.f32 %v1136_v26, %v2705_v51 }
 0xe8d   :  { %v1203_v36 = vmul.f32 %v1202_v27, %v2709_v53 }
 0xefa   :  { %v1140_v28 = vpop.permute.xlu0 %1139 }
 0xefb   :  { %v1206_v29 = vpop.permute.xlu1 %1205  ;;  %v1142_v30 = vmul.f32 %v1140_v28, %v1136_v26 }
 0xefc   :  { %v1208_v31 = vmul.f32 %v1206_v29, %v1202_v27 }
 0xefd   :  { %1144 = vrot.lane.b32.xlu0 %v1142_v30, %s2387_s29 }
 0xefe   :  { %1210 = vrot.lane.b32.xlu1 %v1208_v31, %s2387_s29 }
 0xf6f   :  { %v1145_v33 = vpop.permute.xlu0 %1144 }
 0xf70   :  { %v1211_v37 = vpop.permute.xlu1 %1210  ;;  %v2746_v39 = vadd.f32 %v1145_v33, %v1137_v32  ;;  %v2361_v33 = vld [vmem:[%s2883_s2] sm:$0xff]  }
 0xf71   :  { %v2748_v41 = vadd.f32 %v1211_v37, %v1203_v36  ;;  %v2360_v36 = vld [vmem:[%s2883_s2 + $0x8] sm:$0xff]  }
 0xf72   :  { %2332 = vtanh.f32 %v2746_v39 }
 0xf73   :  { %2334 = vtanh.f32 %v2748_v41 }
 0xf7f   :  { %v2333_v42 = vpop.eup %2332 }
 0xf80   :  { %v2335_v43 = vpop.eup %2334  ;;  %1150 = vrot.lane.b32.xlu0 %v2333_v42, %s2387_s29 }
 0xf81   :  { %1216 = vrot.lane.b32.xlu1 %v2335_v43, %s2387_s29  ;;  %v1517_v43 = vunpack.c.h.bf16 %v2778_v57 }
 0xff2   :  { %v1151_v44 = vpop.permute.xlu0 %1150 }
 0xff3   :  { %v1217_v45 = vpop.permute.xlu1 %1216  ;;  %v1153_v46 = vmul.f32 %v1151_v44, %v1136_v26 }
 0xff4   :  { %v1219_v47 = vmul.f32 %v1217_v45, %v1202_v27 }
 0xff5   :  { %v1154_v48 = vpack.c.bf16 %v1153_v46, %v1153_v46 }
 0xff6   :  { %v1220_v49 = vpack.c.bf16 %v1219_v47, %v1219_v47 }
 0xff7   :  { %1222 = vrot.lane.b32.xlu0 %v1154_v48, %s2388_s0 }
 0xff8   :  { %1268 = vrot.lane.b32.xlu1 %v1220_v49, %s2388_s0 }
0x1069   :  { %v1223_v51 = vpop.permute.xlu0 %1222 }
0x106a   :  { %v1269_v50 = vpop.permute.xlu1 %1268  ;;  %2190 = vmatmul.mubr.msk.bf16.vlgmr.msra.gmra.mxu0 %vm81_vm0, %v1223_v51 }
0x106b   :  { %2198 = vmatmul.mubr.msk.bf16.vlgmr.msra.gmra.mxu1 %vm81_vm0, %v1269_v50  ;;  %2202 = vmatpush3.bf16.msra.mxu0 %v2464_v5 }
0x106c   :  { %2203 = vmatprep.subr.bf16.mxu0 %v2385_v3  ;;  %2205 = vmatprep.mubr.msk.bf16.mxu0 %vm2386_vm1, %v2385_v3 }
0x106d   :  { %2210 = vmatpush3.bf16.msra.mxu1 %v2504_v34  ;;  %2213 = vmatprep.mubr.msk.bf16.mxu1 %vm2386_vm1, %v2385_v3 }
0x106e   :  { %2211 = vmatprep.subr.bf16.mxu1 %v2385_v3 }
0x106f   :  { %2204 = vmatpush3.bf16.msra.mxu0 %v2469_v6 }
0x1070   :  { %2217 = vmatprep.subr.bf16.mxu0 %v2385_v3 }
0x1071   :  { %2212 = vmatpush3.bf16.msra.mxu1 %v2521_v38 }
0x1072   :  { %2206 = vmatmul.mubr.msk.bf16.vlgmr.msra.gmra.mxu0 %vm81_vm0, %v1269_v50  ;;  %2225 = vmatprep.subr.bf16.mxu1 %v2385_v3 }
0x1073   :  { %2218 = vmatpush3.bf16.msra.mxu0 %v2509_v35  ;;  %2221 = vmatprep.mubr.msk.bf16.mxu0 %vm2386_vm1, %v2385_v3 }
0x1074   :  { %2219 = vmatprep.subr.bf16.mxu0 %v2385_v3 }
0x1077   :  { %2220 = vmatpush3.bf16.msra.mxu0 %v2530_v40 }
0x1078   :  { %2233 = vmatprep.subr.bf16.mxu0 %v2385_v3 }
0x112a   :  { %v1261_v5 = vpop.f32.mrf.mxu0 }
0x112b   :  { %v1307_v6 = vpop.f32.mrf.mxu1 }
0x112c   :  { %v1308_v52 = vadd.f32 %v1307_v6, %v1261_v5  ;;  %v2191_v53 = vpop.f32.mrf.mxu0 }
0x112d   :  { %v2199_v54 = vpop.f32.mrf.mxu1 }
0x112e   :  { %v1313_v55 = vadd.f32 %v2569_v58, %v1308_v52  ;;  %v1264_v56 = vpop.f32.mrf.mxu0 }
0x112f   :  { %v1310_v59 = vpop.f32.mrf.mxu1 }
0x1130   :  { %2336 = vtanh.f32 %v1313_v55  ;;  %v2192_v60 = vpop.f32.mrf.mxu0 }
0x1131   :  { %v2200_v61 = vpop.f32.mrf.mxu1 }
0x1132   :  { %v1372_v63 = vpop.f32.mrf.mxu0 }
0x1133   :  { %v1378_v0 = vadd.f32 %v1372_v63, %v1337_v62 }
0x1134   :  { %v2207_v1 = vpop.f32.mrf.mxu0 }
0x1135   :  { %v1379_v2 = vadd.f32 %v2489_v21, %v1378_v0 }
0x1136   :  { %v1375_v4 = vpop.f32.mrf.mxu0 }
0x1137   :  { %2338 = vtanh.f32 %v1379_v2 }
0x1138   :  { %v2208_v7 = vpop.f32.mrf.mxu0 }
0x113d   :  { %v2337_v8 = vpop.eup %2336 }
0x113e   :  { %1319 = vrot.lane.b32.xlu0 %v2337_v8, %s2387_s29  ;;  %v1315_v10 = vmul.f32 0.5, %v2337_v8 }
0x1140   :  { %v1316_v11 = vadd.f32 0.5, %v1315_v10 }
0x1142   :  { %v1317_v21 = vmul.f32 %v1316_v11, %v2746_v39 }
0x1144   :  { %v2339_v9 = vpop.eup %2338 }
0x1145   :  { %1385 = vrot.lane.b32.xlu1 %v2339_v9, %s2387_s29  ;;  %v1381_v14 = vmul.f32 0.5, %v2339_v9 }
0x1147   :  { %v1382_v15 = vadd.f32 0.5, %v1381_v14 }
0x1149   :  { %v1383_v20 = vmul.f32 %v1382_v15, %v2748_v41 }
0x11b0   :  { %v1320_v12 = vpop.permute.xlu0 %1319 }
0x11b1   :  { %v1322_v13 = vmul.f32 %v1320_v12, %v1316_v11 }
0x11b3   :  { %1324 = vrot.lane.b32.xlu0 %v1322_v13, %s2387_s29 }
0x11b7   :  { %v1386_v16 = vpop.permute.xlu1 %1385 }
0x11b8   :  { %v1388_v17 = vmul.f32 %v1386_v16, %v1382_v15 }
0x11ba   :  { %1390 = vrot.lane.b32.xlu1 %v1388_v17, %s2387_s29 }
0x1225   :  { %v1325_v18 = vpop.permute.xlu0 %1324 }
0x1226   :  { %v2787_v19 = vadd.f32 %v1325_v18, %v1317_v21 }
0x1228   :  { %2340 = vtanh.f32 %v2787_v19 }
0x122c   :  { %v1391_v22 = vpop.permute.xlu1 %1390 }
0x122d   :  { %v2791_v24 = vadd.f32 %v1391_v22, %v1383_v20 }
0x122f   :  { %2342 = vtanh.f32 %v2791_v24 }
0x1235   :  { %v2341_v23 = vpop.eup %2340 }
0x1236   :  { %1330 = vrot.lane.b32.xlu0 %v2341_v23, %s2387_s29 }
0x123c   :  { %v2343_v25 = vpop.eup %2342 }
0x123d   :  { %1396 = vrot.lane.b32.xlu1 %v2343_v25, %s2387_s29 }
0x12a8   :  { %v1331_v26 = vpop.permute.xlu0 %1330 }
0x12a9   :  { %v1333_v27 = vmul.f32 %v1331_v26, %v1316_v11 }
0x12ab   :  { %v1334_v28 = vpack.c.bf16 %v1333_v27, %v1333_v27 }
0x12ad   :  { %1402 = vrot.lane.b32.xlu0 %v1334_v28, %s2388_s0 }
0x12af   :  { %v1397_v29 = vpop.permute.xlu1 %1396 }
0x12b0   :  { %v1399_v30 = vmul.f32 %v1397_v29, %v1382_v15 }
0x12b2   :  { %v1400_v31 = vpack.c.bf16 %v1399_v30, %v1399_v30 }
0x12b4   :  { %1448 = vrot.lane.b32.xlu1 %v1400_v31, %s2388_s0 }
0x131f   :  { %v1403_v32 = vpop.permute.xlu0 %1402 }
0x1320   :  { %2214 = vmatmul.mubr.msk.bf16.vlgmr.msra.gmra.mxu1 %vm81_vm0, %v1403_v32 }
0x1321   :  { %2226 = vmatpush3.bf16.msra.mxu1 %v2360_v36  ;;  %2229 = vmatprep.mubr.msk.bf16.mxu1 %vm2386_vm1, %v2385_v3 }
0x1322   :  { %2227 = vmatprep.subr.bf16.mxu1 %v2385_v3 }
0x1325   :  { %2228 = vmatpush3.bf16.msra.mxu1 %v2361_v33 }
0x1326   :  { %v1449_v37 = vpop.permute.xlu1 %1448  ;;  %2241 = vmatprep.subr.bf16.mxu1 %v2385_v3 }
0x1327   :  { %2222 = vmatmul.mubr.msk.bf16.vlgmr.msra.gmra.mxu0 %vm81_vm0, %v1449_v37 }
0x1328   :  { %2230 = vmatmul.mubr.msk.bf16.vlgmr.msra.gmra.mxu1 %vm81_vm0, %v1449_v37  ;;  %2234 = vmatpush3.bf16.msra.mxu0 %v2504_v34 }
0x1329   :  { %2242 = vmatpush3.bf16.msra.mxu1 %v2509_v35  ;;  %2235 = vmatprep.subr.bf16.mxu0 %v2385_v3 }
0x132a   :  { %2243 = vmatprep.subr.bf16.mxu1 %v2385_v3  ;;  %2245 = vmatprep.mubr.msk.bf16.mxu1 %vm2386_vm1, %v2385_v3 }
0x132b   :  { %2237 = vmatprep.mubr.msk.bf16.mxu0 %vm2386_vm1, %v2385_v3 }
0x132c   :  { %2236 = vmatpush3.bf16.msra.mxu0 %v2521_v38 }
0x132d   :  { %2244 = vmatpush3.bf16.msra.mxu1 %v2530_v40  ;;  %2249 = vmatprep.subr.bf16.mxu0 %v2385_v3  ;;  %v2362_v40 = vld [vmem:[%s2884_s3] ss:$0 sm:$0xff] }
0x132e   :  { %2257 = vmatprep.subr.bf16.mxu1 %v2385_v3 }
0x13e0   :  { %v1441_v34 = vpop.f32.mrf.mxu1 }
0x13e2   :  { %v2215_v35 = vpop.f32.mrf.mxu1 }
0x13e4   :  { %v1444_v39 = vpop.f32.mrf.mxu1 }
0x13e5   :  { %v2288_v39 = vld [vmem:[%s2889_s8 + $0x18] sm:$0xff]  }
0x13e6   :  { %v2216_v41 = vpop.f32.mrf.mxu1 }
0x13e7   :  { %v1487_v42 = vpop.f32.mrf.mxu0  ;;  %v2289_v41 = vld [vmem:[%s2889_s8 + $0x10] sm:$0xff]  }
0x13e8   :  { %v1488_v44 = vadd.f32 %v1487_v42, %v1441_v34  ;;  %v1552_v45 = vpop.f32.mrf.mxu1  ;;  %v2287_v34 = vld [vmem:[%s2887_s6] sm:$0xff]  }
0x13e9   :  { %v1558_v46 = vadd.f32 %v1552_v45, %v1517_v43  ;;  %v2223_v47 = vpop.f32.mrf.mxu0 }
0x13ea   :  { %v1493_v48 = vadd.f32 %v2569_v58, %v1488_v44  ;;  %v2231_v38 = vpop.f32.mrf.mxu1  ;;  %v2291_v47 = vld [vmem:[%s2889_s8] sm:$0xff]  }
0x13eb   :  { %v1559_v49 = vadd.f32 %v2362_v40, %v1558_v46  ;;  %v1490_v51 = vpop.f32.mrf.mxu0  ;;  %v2290_v46 = vld [vmem:[%s2889_s8 + $0x8] sm:$0xff]  }
0x13ec   :  { %2344 = vtanh.f32 %v1493_v48  ;;  %v1555_v50 = vpop.f32.mrf.mxu1  ;;  %v1926_v48 = vld [vmem:[%s2888_s7] ss:$0 sm:$0xff]  ;;  %s2389_s7 = smov [#allocation3]  }
0x13ed   :  { %2346 = vtanh.f32 %v1559_v49  ;;  %v2224_v5 = vpop.f32.mrf.mxu0  ;;  %s1865_s8 = sshll.u32 %s2389_s7, 4  ;;  %s1866_s8 = int_to_ptr.vmem [resolvable:$true] %s1865_s8 }
0x13ee   :  { %v2232_v6 = vpop.f32.mrf.mxu1  ;;  %p2368_p1 = scmp.lt.s32.totalorder %s1866_s8, %s1866_s8 }
0x13f9   :  { %v2345_v52 = vpop.eup %2344 }
0x13fa   :  { %v2347_v53 = vpop.eup %2346  ;;  %1499 = vrot.lane.b32.xlu0 %v2345_v52, %s2387_s29  ;;  %v1495_v54 = vmul.f32 0.5, %v2345_v52 }
0x13fb   :  { %1565 = vrot.lane.b32.xlu1 %v2347_v53, %s2387_s29  ;;  %v1561_v55 = vmul.f32 0.5, %v2347_v53 }
0x13fc   :  { %v1496_v56 = vadd.f32 0.5, %v1495_v54 }
0x13fd   :  { %v1562_v57 = vadd.f32 0.5, %v1561_v55 }
0x13fe   :  { %v1497_v63 = vmul.f32 %v1496_v56, %v2787_v19 }
0x13ff   :  { %v1563_v0 = vmul.f32 %v1562_v57, %v2791_v24 }
0x146c   :  { %v1500_v59 = vpop.permute.xlu0 %1499 }
0x146d   :  { %v1566_v60 = vpop.permute.xlu1 %1565  ;;  %v1502_v61 = vmul.f32 %v1500_v59, %v1496_v56 }
0x146e   :  { %v1568_v62 = vmul.f32 %v1566_v60, %v1562_v57 }
0x146f   :  { %1504 = vrot.lane.b32.xlu0 %v1502_v61, %s2387_s29 }
0x1470   :  { %1570 = vrot.lane.b32.xlu1 %v1568_v62, %s2387_s29 }
0x14e1   :  { %v1505_v1 = vpop.permute.xlu0 %1504 }
0x14e2   :  { %v1571_v2 = vpop.permute.xlu1 %1570  ;;  %v1507_v4 = vadd.f32 %v1505_v1, %v1497_v63 }
0x14e3   :  { %v1573_v7 = vadd.f32 %v1571_v2, %v1563_v0 }
0x14e4   :  { %2348 = vtanh.f32 %v1507_v4 }
0x14e5   :  { %2350 = vtanh.f32 %v1573_v7 }
0x14f1   :  { %v2349_v8 = vpop.eup %2348 }
0x14f2   :  { %v2351_v9 = vpop.eup %2350  ;;  %1510 = vrot.lane.b32.xlu0 %v2349_v8, %s2387_s29 }
0x14f3   :  { %1576 = vrot.lane.b32.xlu1 %v2351_v9, %s2387_s29 }
0x1564   :  { %v1511_v10 = vpop.permute.xlu0 %1510 }
0x1565   :  { %v1577_v11 = vpop.permute.xlu1 %1576  ;;  %v1513_v12 = vmul.f32 %v1511_v10, %v1496_v56 }
0x1566   :  { %v1579_v13 = vmul.f32 %v1577_v11, %v1562_v57 }
0x1567   :  { %v1514_v14 = vpack.c.bf16 %v1513_v12, %v1513_v12 }
0x1568   :  { %v1580_v15 = vpack.c.bf16 %v1579_v13, %v1579_v13 }
0x1569   :  { %1582 = vrot.lane.b32.xlu0 %v1514_v14, %s2388_s0 }
0x156a   :  { %1628 = vrot.lane.b32.xlu1 %v1580_v15, %s2388_s0 }
0x15db   :  { %v1583_v16 = vpop.permute.xlu0 %1582 }
0x15dc   :  { %v1629_v17 = vpop.permute.xlu1 %1628  ;;  %2238 = vmatmul.mubr.msk.bf16.vlgmr.msra.gmra.mxu0 %vm81_vm0, %v1583_v16 }
0x15dd   :  { %2246 = vmatmul.mubr.msk.bf16.vlgmr.msra.gmra.mxu1 %vm81_vm0, %v1629_v17  ;;  %2253 = vmatprep.mubr.msk.bf16.mxu0 %vm2386_vm1, %v2385_v3 }
0x15de   :  { %2265 = vmatprep.mubr.msk.bf16.mxu1 %vm2386_vm1, %v2385_v3  ;;  %2258 = vmatpush3.bf16.msra.mxu1 %v2288_v39 }
0x15df   :  { %2259 = vmatprep.subr.bf16.mxu1 %v2385_v3 }
0x15e2   :  { %2260 = vmatpush3.bf16.msra.mxu1 %v2289_v41 }
0x15e3   :  { %2261 = vmatprep.subr.bf16.mxu1 %v2385_v3 }
0x15e6   :  { %2262 = vmatpush3.bf16.msra.mxu1 %v2290_v46 }
0x15e7   :  { %2263 = vmatprep.subr.bf16.mxu1 %v2385_v3 }
0x15ea   :  { %2264 = vmatpush3.bf16.msra.mxu1 %v2291_v47 }
0x169c   :  { %v1621_v21 = vpop.f32.mrf.mxu0 }
0x169d   :  { %v1667_v18 = vpop.f32.mrf.mxu1 }
0x169e   :  { %v1668_v19 = vadd.f32 %v1667_v18, %v1621_v21  ;;  %v2239_v20 = vpop.f32.mrf.mxu0 }
0x169f   :  { %v2247_v22 = vpop.f32.mrf.mxu1 }
0x16a0   :  { %v1673_v24 = vadd.f32 %v2569_v58, %v1668_v19  ;;  %v1624_v23 = vpop.f32.mrf.mxu0  ;;  %v2286_v58 = vld [vmem:[%s2887_s6 + $0x8] sm:$0xff]  }
0x16a1   :  { %v1670_v25 = vpop.f32.mrf.mxu1  ;;  %2250 = vmatpush3.bf16.msra.mxu0 %v2286_v58 }
0x16a2   :  { %2352 = vtanh.f32 %v1673_v24  ;;  %v2240_v26 = vpop.f32.mrf.mxu0  ;;  %2251 = vmatprep.subr.bf16.mxu0 %v2385_v3  ;;  %v1930_v3 = vld [vmem:[%s2890_s9] ss:$0 sm:$0xff]  ;;  %s2363_s9 = scalar_lea.vmem %s1866_s8, 128 }
0x16a3   :  { %v2248_v27 = vpop.f32.mrf.mxu1  ;;  %p2364_p0 = scmp.ne.s32.totalorder %s1866_s8, %s2363_s9  ;;  %p2369_p2 = scmp.lt.s32.totalorder %s2363_s9, %s2363_s9 }
0x16a5   :  { %2252 = vmatpush3.bf16.msra.mxu0 %v2287_v34  ;;  %p2370_p3 = por %p2369_p2, %p2368_p1 }
0x16a7   :  { %p2371_p4 = pnand %p2370_p3, %p2364_p0 }
0x16af   :  { %v2353_v28 = vpop.eup %2352 }
0x16b0   :  { %1679 = vrot.lane.b32.xlu0 %v2353_v28, %s2387_s29  ;;  %v1675_v29 = vmul.f32 0.5, %v2353_v28 }
0x16b2   :  { %v1676_v30 = vadd.f32 0.5, %v1675_v29 }
0x16b4   :  { %v1677_v36 = vmul.f32 %v1676_v30, %v1507_v4 }
0x1722   :  { %v1680_v31 = vpop.permute.xlu0 %1679 }
0x1723   :  { %v1682_v32 = vmul.f32 %v1680_v31, %v1676_v30 }
0x1725   :  { %1684 = vrot.lane.b32.xlu1 %v1682_v32, %s2387_s29 }
0x1797   :  { %v1685_v33 = vpop.permute.xlu1 %1684 }
0x1798   :  { %v1687_v37 = vadd.f32 %v1685_v33, %v1677_v36 }
0x179a   :  { %2354 = vtanh.f32 %v1687_v37 }
0x17a7   :  { %v2355_v35 = vpop.eup %2354 }
0x17a8   :  { %1690 = vrot.lane.b32.xlu0 %v2355_v35, %s2387_s29 }
0x181a   :  { %v1691_v42 = vpop.permute.xlu0 %1690 }
0x181b   :  { %v1693_v43 = vmul.f32 %v1691_v42, %v1676_v30 }
0x181d   :  { %v1694_v44 = vpack.c.bf16 %v1693_v43, %v1693_v43 }
0x181f   :  { %1707 = vrot.lane.b32.xlu1 %v1694_v44, %s2388_s0 }
0x1891   :  { %v1708_v45 = vpop.permute.xlu1 %1707 }
0x1892   :  { %2254 = vmatmul.mubr.msk.bf16.vlgmr.msra.gmra.mxu0 %vm81_vm0, %v1708_v45 }
0x1952   :  { %v1758_v38 = vpop.f32.mrf.mxu0 }
0x1953   :  { %v1759_v40 = vadd.f32 %v1926_v48, %v1758_v38 }
0x1954   :  { %v2255_v49 = vpop.f32.mrf.mxu0 }
0x1955   :  { %v1764_v51 = vmax.f32 %v1759_v40, 0.0 }
0x1956   :  { %v1761_v50 = vpop.f32.mrf.mxu0 }
0x1957   :  { %v1765_v5 = vpack.c.bf16 %v1764_v51, %v1764_v51 }
0x1958   :  { %v2256_v6 = vpop.f32.mrf.mxu0 }
0x1959   :  { %2266 = vmatmul.mubr.msk.bf16.vlgmr.msra.gmra.mxu1 %vm1805_vm2, %v1765_v5 }
0x1a19   :  { %v1843_v52 = vpop.f32.mrf.mxu1 }
0x1a1a   :  { %v1844_v53 = vadd.f32 %v1930_v3, %v1843_v52 }
0x1a1b   :  { %v2267_v54 = vpop.f32.mrf.mxu1 }
0x1a1c   :  { %1849 = vmax.xlane.f32.xlu0 %v1844_v53 }
0x1a1d   :  { %v1846_v55 = vpop.f32.mrf.mxu1 }
0x1a1f   :  { %v2268_v56 = vpop.f32.mrf.mxu1 }
0x1aa5   :  { %v1850_v57 = vpop.xlane.xlu0 %1849 }
0x1aa6   :  { %v1851_v59 = vsub.f32 %v1844_v53, %v1850_v57 }
0x1aa8   :  { %v1852_v60 = vmul.f32 1.442695, %v1851_v59 }
0x1aaa   :  { %2356 = vpow2.f32 %v1852_v60 }
0x1ab7   :  { %v2357_v61 = vpop.eup %2356 }
0x1ab8   :  { %1854 = vadd.xlane.f32.xlu1 %v2357_v61 }
0x1b41   :  { %v1855_v62 = vpop.xlane.xlu1 %1854 }
0x1b42   :  { %2358 = vrcp.f32 %v1855_v62 }
0x1b4f   :  { %v2359_v63 = vpop.eup %2358 }
0x1b50   :  { %v1857_v0 = vmul.f32 %v2359_v63, %v2357_v61 }
0x1b52   :  { %1858 = vst [vmem:[#allocation3] sm:$0xff] %v1857_v0 }
0x1b53   :  { %2374 = shalt.err (!%p2371_p4)
}
0x1b54   :  { %1868 = dma.vmem_to_hbm [thread:$0]  %s1866_s8, 128, %s2891_s10, [#allocation4]  }
0x1b55   :  { %2383 = dma.done.wait [#allocation4], 128  }
0x1b56   :  { %2384 = vsyncadd [#allocation4], 4294967168 }
0x1b57   :  { %1872 = vsyncpa [#allocation4], 1 }

</bundles_post_ra>
